<compile_context>
chip_gen: v5e
topology: v5e:2x2
jax: 0.10.0
libtpu: 0.0.40
codegen_flags: <defaults>
</compile_context>

<pallas_src>
import jax
import jax.numpy as jnp
from jax.experimental import pallas as pl
from jax.experimental.pallas import tpu as pltpu

N_CLASS = 10
D_IN = 500
D_H1 = 1024
D_H2 = 256
BN_EPS = 1e-5

D_IN_PAD = 512      # 500 -> 512  (multiple of 128 lanes: clean MXU K tiles)
N_CLASS_PAD = 128   # 10  -> 128  (lane-dense output store, padded classes masked)
TM_MAX = 256        # batch tile: fills the 256-wide MXU on v6e/v7x, 2x128 passes on v5e
NEG_BIG = -1e30     # bias for padded classes -> exp(padded logit - max) == 0


def _round_up(n, m):
    return ((n + m - 1) // m) * m


def dnn_kernel(x_ref, w1_ref, c1_ref, w2_ref, c2_ref, w3_ref, c3_ref, o_ref):
    # x tile: (TM, 512) f32.  Weights: bf16 (resident).  Folded biases: f32.
    x = x_ref[...].astype(jnp.bfloat16)

    # [BN0 + Linear1 + BN1] folded into (W1, c1), then ReLU.  Dropout = identity (eval).
    h = jnp.dot(x, w1_ref[...], preferred_element_type=jnp.float32) + c1_ref[...]
    h = jnp.maximum(h, 0.0)

    # [Linear2 + BN2] folded into (W2, c2), then ReLU.  Dropout = identity (eval).
    h = jnp.dot(h.astype(jnp.bfloat16), w2_ref[...],
                preferred_element_type=jnp.float32) + c2_ref[...]
    h = jnp.maximum(h, 0.0)

    # Linear3 (class dim padded to 128; padded columns get bias -1e30).
    logits = jnp.dot(h.astype(jnp.bfloat16), w3_ref[...],
                     preferred_element_type=jnp.float32) + c3_ref[...]

    # softmax over the class axis; padded classes contribute exp(-huge) == 0.
    m = jnp.max(logits, axis=1, keepdims=True)
    e = jnp.exp(logits - m)
    denom = jnp.sum(e, axis=1, keepdims=True)
    o_ref[...] = (e * pl.reciprocal(denom, approx=True)).astype(o_ref.dtype)


def prepare_kernel_params(p):
    """Fold eval-mode BN + biases into the weights, pad, and cast weights to bf16."""
    f32 = jnp.float32

    def bn_fold(g, b, mean, var):
        s = g / jnp.sqrt(var + BN_EPS)
        t = b - mean * s
        return s.astype(f32), t.astype(f32)

    s0, t0 = bn_fold(p["bn0_g"], p["bn0_b"], p["bn0_m"], p["bn0_v"])
    s1, t1 = bn_fold(p["bn1_g"], p["bn1_b"], p["bn1_m"], p["bn1_v"])
    s2, t2 = bn_fold(p["bn2_g"], p["bn2_b"], p["bn2_m"], p["bn2_v"])

    W1 = p["w1"].T.astype(f32)   # PyTorch weight is (out, in) -> (500, 1024)
    W2 = p["w2"].T.astype(f32)   # (1024, 256)
    W3 = p["w3"].T.astype(f32)   # (256, 10)

    # ((x*s0 + t0) @ W1 + b1) * s1 + t1  ==  x @ W1f + c1
    W1f = (s0[:, None] * W1) * s1[None, :]
    c1 = (t0 @ W1) * s1 + p["b1"] * s1 + t1
    # (h @ W2 + b2) * s2 + t2  ==  h @ W2f + c2
    W2f = W2 * s2[None, :]
    c2 = p["b2"] * s2 + t2
    W3f = W3
    c3 = p["b3"].astype(f32)

    # Zero-pad contraction dim 500 -> 512 and class dim 10 -> 128.
    W1f = jnp.pad(W1f, ((0, D_IN_PAD - D_IN), (0, 0)))
    W3f = jnp.pad(W3f, ((0, 0), (0, N_CLASS_PAD - N_CLASS)))
    c3 = jnp.pad(c3, (0, N_CLASS_PAD - N_CLASS), constant_values=NEG_BIG)

    bf16 = jnp.bfloat16
    return dict(
        w1=W1f.astype(bf16), c1=c1[None, :].astype(f32),
        w2=W2f.astype(bf16), c2=c2[None, :].astype(f32),
        w3=W3f.astype(bf16), c3=c3[None, :].astype(f32),
    )


def dnn_forward(x, kp):
    """x: (B, 500) float32.  kp: folded/padded/bf16 kernel params."""
    B = x.shape[0]
    tm = TM_MAX if B >= TM_MAX else _round_up(max(B, 1), 8)
    Bp = _round_up(B, tm)

    # Pad batch to a multiple of the tile and features 500 -> 512 (zeros).
    xp = jnp.pad(x.astype(jnp.float32), ((0, Bp - B), (0, D_IN_PAD - D_IN)))

    resident = lambda i: (0, 0)   # weights/biases: same block every step -> stay in VMEM
    out = pl.pallas_call(
        dnn_kernel,
        out_shape=jax.ShapeDtypeStruct((Bp, N_CLASS_PAD), jnp.float32),
        grid=(Bp // tm,),
        in_specs=[
            pl.BlockSpec((tm, D_IN_PAD), lambda i: (i, 0)),      # x tile (pipelined)
            pl.BlockSpec((D_IN_PAD, D_H1), resident),            # W1 (bf16, resident)
            pl.BlockSpec((1, D_H1), resident),                   # c1
            pl.BlockSpec((D_H1, D_H2), resident),                # W2
            pl.BlockSpec((1, D_H2), resident),                   # c2
            pl.BlockSpec((D_H2, N_CLASS_PAD), resident),         # W3
            pl.BlockSpec((1, N_CLASS_PAD), resident),            # c3
        ],
        out_specs=pl.BlockSpec((tm, N_CLASS_PAD), lambda i: (i, 0)),
        compiler_params=pltpu.CompilerParams(
            dimension_semantics=("parallel",)),
    )(xp, kp["w1"], kp["c1"], kp["w2"], kp["c2"], kp["w3"], kp["c3"])

    return out[:B, :N_CLASS]


def init_params(key):
    """Random parameters in PyTorch layout (Linear weight (out,in), BN running stats)."""
    ks = jax.random.split(key, 6)
    f32 = jnp.float32

    def bn(k, d):
        k1, k2, k3, k4 = jax.random.split(k, 4)
        return (1.0 + 0.1 * jax.random.normal(k1, (d,), f32),
                0.1 * jax.random.normal(k2, (d,), f32),
                0.1 * jax.random.normal(k3, (d,), f32),
                jax.random.uniform(k4, (d,), f32, 0.5, 1.5))

    def linear(k, d_in, d_out):
        k1, k2 = jax.random.split(k, 2)
        bound = 1.0 / jnp.sqrt(d_in)
        w = jax.random.uniform(k1, (d_out, d_in), f32, -bound, bound)
        b = jax.random.uniform(k2, (d_out,), f32, -bound, bound)
        return w, b

    g0, b0, m0, v0 = bn(ks[0], D_IN)
    w1, lb1 = linear(ks[1], D_IN, D_H1)
    g1, bb1, m1, v1 = bn(ks[2], D_H1)
    w2, lb2 = linear(ks[3], D_H1, D_H2)
    g2, bb2, m2, v2 = bn(ks[4], D_H2)
    w3, lb3 = linear(ks[5], D_H2, N_CLASS)

    return dict(
        bn0_g=g0, bn0_b=b0, bn0_m=m0, bn0_v=v0,
        w1=w1, b1=lb1,
        bn1_g=g1, bn1_b=bb1, bn1_m=m1, bn1_v=v1,
        w2=w2, b2=lb2,
        bn2_g=g2, bn2_b=bb2, bn2_m=m2, bn2_v=v2,
        w3=w3, b3=lb3,
    )


def reference_forward(x, p):
    """Pure-JAX f32 mirror of the PyTorch eval-mode forward."""
    def bn(h, g, b, m, v):
        return (h - m) / jnp.sqrt(v + BN_EPS) * g + b

    h = bn(x, p["bn0_g"], p["bn0_b"], p["bn0_m"], p["bn0_v"])
    h = h @ p["w1"].T + p["b1"]
    h = jnp.maximum(bn(h, p["bn1_g"], p["bn1_b"], p["bn1_m"], p["bn1_v"]), 0.0)
    h = h @ p["w2"].T + p["b2"]
    h = jnp.maximum(bn(h, p["bn2_g"], p["bn2_b"], p["bn2_m"], p["bn2_v"]), 0.0)
    logits = h @ p["w3"].T + p["b3"]
    return jax.nn.softmax(logits, axis=1)


if __name__ == "__main__":
    key = jax.random.PRNGKey(0)
    k_param, k_x = jax.random.split(key)

    B = 8
    x = jax.random.normal(k_x, (B, D_IN), jnp.float32)

    params = init_params(k_param)
    kparams = prepare_kernel_params(params)

    out = dnn_forward(x, kparams)
    out = jax.block_until_ready(out)

    ref = reference_forward(x, params)

    assert out.shape == (B, N_CLASS)
    assert bool(jnp.all(jnp.isfinite(out)))
    # probabilities: rows sum to 1 (EUP approx reciprocal -> small tolerance)
    assert jnp.allclose(jnp.sum(out, axis=1), 1.0, atol=1e-2)
    # bf16 matmuls vs f32 reference: probabilities agree to well within 2e-2
    assert jnp.allclose(out, ref, atol=2e-2)

    print("KERNEL_OK")
</pallas_src>

<mosaic_0001>
module attributes {stable_mosaic.version = 11 : i64} {
  func.func @dnn_kernel(%arg0: i32, %arg1: memref<8x512xf32, #tpu.memory_space<vmem>>, %arg2: memref<512x1024xbf16, #tpu.memory_space<vmem>>, %arg3: memref<1x1024xf32, #tpu.memory_space<vmem>>, %arg4: memref<1024x256xbf16, #tpu.memory_space<vmem>>, %arg5: memref<1x256xf32, #tpu.memory_space<vmem>>, %arg6: memref<256x128xbf16, #tpu.memory_space<vmem>>, %arg7: memref<1x128xf32, #tpu.memory_space<vmem>>, %arg8: memref<8x128xf32, #tpu.memory_space<vmem>>) attributes {dimension_semantics = [#tpu.dimension_semantics<parallel>], iteration_bounds = array<i64: 1>, scalar_prefetch = 0 : i64, scratch_operands = 0 : i64, tpu.core_type = #tpu.core_type<tc>, window_params = [{transform_indices = @transform_0, window_bounds = array<i64: 8, 512>}, {pipeline_mode = #tpu.pipeline_mode<synchronous>, transform_indices = @transform_1, window_bounds = array<i64: 512, 1024>}, {pipeline_mode = #tpu.pipeline_mode<synchronous>, transform_indices = @transform_2, window_bounds = array<i64: 1, 1024>}, {pipeline_mode = #tpu.pipeline_mode<synchronous>, transform_indices = @transform_3, window_bounds = array<i64: 1024, 256>}, {pipeline_mode = #tpu.pipeline_mode<synchronous>, transform_indices = @transform_4, window_bounds = array<i64: 1, 256>}, {pipeline_mode = #tpu.pipeline_mode<synchronous>, transform_indices = @transform_5, window_bounds = array<i64: 256, 128>}, {pipeline_mode = #tpu.pipeline_mode<synchronous>, transform_indices = @transform_6, window_bounds = array<i64: 1, 128>}, {transform_indices = @transform_7, window_bounds = array<i64: 8, 128>}]} {
    %c0 = arith.constant 0 : index
    %c0_0 = arith.constant 0 : index
    %0 = vector.load %arg1[%c0, %c0_0] : memref<8x512xf32, #tpu.memory_space<vmem>>, vector<8x512xf32>
    %1 = arith.truncf %0 : vector<8x512xf32> to vector<8x512xbf16>
    %c0_1 = arith.constant 0 : index
    %c0_2 = arith.constant 0 : index
    %2 = vector.load %arg2[%c0_1, %c0_2] : memref<512x1024xbf16, #tpu.memory_space<vmem>>, vector<512x1024xbf16>
    %cst = arith.constant dense<0.000000e+00> : vector<8x1024xf32>
    %3 = tpu.matmul %1, %2, %cst {dimension_numbers = #tpu.dot_dimension_numbers<[1], [0], [0], [1], [0, 0, 1, 1], [], []>} : vector<8x512xbf16>, vector<512x1024xbf16>, vector<8x1024xf32> -> vector<8x1024xf32>
    %c0_3 = arith.constant 0 : index
    %c0_4 = arith.constant 0 : index
    %4 = vector.load %arg3[%c0_3, %c0_4] : memref<1x1024xf32, #tpu.memory_space<vmem>>, vector<1x1024xf32>
    %5 = vector.broadcast %4 : vector<1x1024xf32> to vector<8x1024xf32>
    %6 = arith.addf %3, %5 : vector<8x1024xf32>
    %cst_5 = arith.constant 0.000000e+00 : f32
    %7 = vector.broadcast %cst_5 : f32 to vector<8x1024xf32>
    %8 = arith.maximumf %6, %7 : vector<8x1024xf32>
    %9 = arith.truncf %8 : vector<8x1024xf32> to vector<8x1024xbf16>
    %c0_6 = arith.constant 0 : index
    %c0_7 = arith.constant 0 : index
    %10 = vector.load %arg4[%c0_6, %c0_7] : memref<1024x256xbf16, #tpu.memory_space<vmem>>, vector<1024x256xbf16>
    %cst_8 = arith.constant dense<0.000000e+00> : vector<8x256xf32>
    %11 = tpu.matmul %9, %10, %cst_8 {dimension_numbers = #tpu.dot_dimension_numbers<[1], [0], [0], [1], [0, 0, 1, 1], [], []>} : vector<8x1024xbf16>, vector<1024x256xbf16>, vector<8x256xf32> -> vector<8x256xf32>
    %c0_9 = arith.constant 0 : index
    %c0_10 = arith.constant 0 : index
    %12 = vector.load %arg5[%c0_9, %c0_10] : memref<1x256xf32, #tpu.memory_space<vmem>>, vector<1x256xf32>
    %13 = vector.broadcast %12 : vector<1x256xf32> to vector<8x256xf32>
    %14 = arith.addf %11, %13 : vector<8x256xf32>
    %cst_11 = arith.constant 0.000000e+00 : f32
    %15 = vector.broadcast %cst_11 : f32 to vector<8x256xf32>
    %16 = arith.maximumf %14, %15 : vector<8x256xf32>
    %17 = arith.truncf %16 : vector<8x256xf32> to vector<8x256xbf16>
    %c0_12 = arith.constant 0 : index
    %c0_13 = arith.constant 0 : index
    %18 = vector.load %arg6[%c0_12, %c0_13] : memref<256x128xbf16, #tpu.memory_space<vmem>>, vector<256x128xbf16>
    %cst_14 = arith.constant dense<0.000000e+00> : vector<8x128xf32>
    %19 = tpu.matmul %17, %18, %cst_14 {dimension_numbers = #tpu.dot_dimension_numbers<[1], [0], [0], [1], [0, 0, 1, 1], [], []>} : vector<8x256xbf16>, vector<256x128xbf16>, vector<8x128xf32> -> vector<8x128xf32>
    %c0_15 = arith.constant 0 : index
    %c0_16 = arith.constant 0 : index
    %20 = vector.load %arg7[%c0_15, %c0_16] : memref<1x128xf32, #tpu.memory_space<vmem>>, vector<1x128xf32>
    %21 = vector.broadcast %20 : vector<1x128xf32> to vector<8x128xf32>
    %22 = arith.addf %19, %21 : vector<8x128xf32>
    %cst_17 = arith.constant dense<0xFF800000> : vector<8xf32>
    %23 = vector.multi_reduction <maximumf>, %22, %cst_17 [1] : vector<8x128xf32> to vector<8xf32>
    %24 = vector.shape_cast %23 : vector<8xf32> to vector<8x1xf32>
    %25 = vector.broadcast %24 : vector<8x1xf32> to vector<8x128xf32>
    %26 = arith.subf %22, %25 : vector<8x128xf32>
    %27 = math.exp %26 : vector<8x128xf32>
    %cst_18 = arith.constant dense<0.000000e+00> : vector<8xf32>
    %28 = vector.multi_reduction <add>, %27, %cst_18 [1] : vector<8x128xf32> to vector<8xf32>
    %29 = vector.shape_cast %28 : vector<8xf32> to vector<8x1xf32>
    %30 = tpu.reciprocal %29 {approx = true} : vector<8x1xf32> -> vector<8x1xf32>
    %31 = vector.broadcast %30 : vector<8x1xf32> to vector<8x128xf32>
    %32 = arith.mulf %27, %31 : vector<8x128xf32>
    %c0_19 = arith.constant 0 : index
    %c0_20 = arith.constant 0 : index
    %33 = vector.load %arg8[%c0_19, %c0_20] : memref<8x128xf32, #tpu.memory_space<vmem>>, vector<8x128xf32>
    tpu.vector_store %arg8[%c0_19, %c0_20], %32 {strides = array<i32>} : memref<8x128xf32, #tpu.memory_space<vmem>>, vector<8x128xf32>,
    return
  }
  func.func @transform_0(%arg0: i32) -> (i32, i32) {
    %c0_i32 = arith.constant 0 : i32
    %c0_i32_0 = arith.constant 0 : i32
    return %arg0, %c0_i32 : i32, i32
  }
  func.func @transform_1(%arg0: i32) -> (i32, i32) {
    %c0_i32 = arith.constant 0 : i32
    %c0_i32_0 = arith.constant 0 : i32
    %c0_i32_1 = arith.constant 0 : i32
    return %c0_i32, %c0_i32_0 : i32, i32
  }
  func.func @transform_2(%arg0: i32) -> (i32, i32) {
    %c0_i32 = arith.constant 0 : i32
    %c0_i32_0 = arith.constant 0 : i32
    %c0_i32_1 = arith.constant 0 : i32
    return %c0_i32, %c0_i32_0 : i32, i32
  }
  func.func @transform_3(%arg0: i32) -> (i32, i32) {
    %c0_i32 = arith.constant 0 : i32
    %c0_i32_0 = arith.constant 0 : i32
    %c0_i32_1 = arith.constant 0 : i32
    return %c0_i32, %c0_i32_0 : i32, i32
  }
  func.func @transform_4(%arg0: i32) -> (i32, i32) {
    %c0_i32 = arith.constant 0 : i32
    %c0_i32_0 = arith.constant 0 : i32
    %c0_i32_1 = arith.constant 0 : i32
    return %c0_i32, %c0_i32_0 : i32, i32
  }
  func.func @transform_5(%arg0: i32) -> (i32, i32) {
    %c0_i32 = arith.constant 0 : i32
    %c0_i32_0 = arith.constant 0 : i32
    %c0_i32_1 = arith.constant 0 : i32
    return %c0_i32, %c0_i32_0 : i32, i32
  }
  func.func @transform_6(%arg0: i32) -> (i32, i32) {
    %c0_i32 = arith.constant 0 : i32
    %c0_i32_0 = arith.constant 0 : i32
    %c0_i32_1 = arith.constant 0 : i32
    return %c0_i32, %c0_i32_0 : i32, i32
  }
  func.func @transform_7(%arg0: i32) -> (i32, i32) {
    %c0_i32 = arith.constant 0 : i32
    %c0_i32_0 = arith.constant 0 : i32
    return %arg0, %c0_i32 : i32, i32
  }
}

</mosaic_0001>

<bundles_post_ra>
// kernel: tpu_custom_call.1
= control target key start
LH: loop header
LB: loop body
LE: loop exit
PB: predicated region body
PF: predicated region fallthrough
CT: control target
= control target key end

     0   :  { %12 = vsyncpa [#allocation3], 0  ;;  %s5612_s0 = inlined_call_operand.hbm [shape: f32[8,512], index: 0, kind: input, shape index: {}]   ;;  %s5613_s1 = inlined_call_operand.hbm [shape: bf16[512,1024], index: 1, kind: input, shape index: {}]   ;;  %s5614_s2 = inlined_call_operand.hbm [shape: f32[1,1024], index: 2, kind: input, shape index: {}]   ;;  %s5615_s3 = inlined_call_operand.hbm [shape: bf16[1024,256], index: 3, kind: input, shape index: {}]   ;;  %s5616_s4 = inlined_call_operand.vmem [shape: f32[1,256], index: 4, kind: input, shape index: {}]   ;;  %s5617_s5 = inlined_call_operand.hbm [shape: bf16[256,128], index: 5, kind: input, shape index: {}]   ;;  %s5618_s6 = inlined_call_operand.vmem [shape: f32[1,128], index: 6, kind: input, shape index: {}]   ;;  %s5619_s7 = inlined_call_operand.hbm [shape: f32[8,128], index: 7, kind: output, shape index: {}]  }
   0x1   :  { %13 = vsyncpa [#allocation6], 0 }
   0x2   :  { %14 = vsyncpa [#allocation9], 0  ;;  %s31_s26 = sshll.u32 %s5613_s1, 4  ;;  %s32_s26 = int_to_ptr.hbm [resolvable:$true] %s31_s26 }
   0x3   :  { %15 = vsyncpa [#allocation4], 0  ;;  %s5438_s27 = smov [#allocation5]   ;;  %s55_s8 = sshll.u32 %s5615_s3, 4  ;;  %s56_s8 = int_to_ptr.hbm [resolvable:$true] %s55_s8 }
   0x4   :  { %s33_s28 = sshll.u32 %s5438_s27, 4  ;;  %s5439_s9 = smov 512   ;;  %s34_s28 = int_to_ptr.vmem [resolvable:$true] %s33_s28 }
   0x5   :  { %s5440_s10 = smov 32   ;;  %s5441_s11 = smov [#allocation8]  }
   0x6   :  { %39 = dma.hbm_to_vmem [thread:$0]  %s32_s26, 32768, %s34_s28, [#allocation6], %s5439_s9, %s5439_s9, %s5440_s10  }
   0x7   :  { %s57_s12 = sshll.u32 %s5441_s11, 4  ;;  %s5442_s13 = smov 128   ;;  %s58_s12 = int_to_ptr.vmem [resolvable:$true] %s57_s12 }
   0x8   :  { %s5443_s14 = smov 8   ;;  %s21_s16 = sshll.u32 %s5612_s0, 4  ;;  %s22_s16 = int_to_ptr.hbm [resolvable:$true] %s21_s16 }
   0x9   :  { %63 = dma.hbm_to_vmem [thread:$0]  %s56_s8, 16384, %s58_s12, [#allocation9], %s5442_s13, %s5442_s13, %s5443_s14  }
   0xa   :  { %s5444_s17 = smov [#allocation2]   ;;  %s45_s20 = sshll.u32 %s5614_s2, 4  ;;  %s46_s20 = int_to_ptr.hbm [resolvable:$true] %s45_s20 }
   0xb   :  { %s23_s18 = sshll.u32 %s5444_s17, 4  ;;  %s5445_s21 = smov [#allocation7]   ;;  %s24_s18 = int_to_ptr.vmem [resolvable:$true] %s23_s18 }
   0xc   :  { %26 = dma.hbm_to_vmem [thread:$0]  %s22_s16, 512, %s24_s18, [#allocation3]  }
   0xd   :  { %s47_s22 = sshll.u32 %s5445_s21, 4  ;;  %s70_s25 = sshll.u32 %s5617_s5, 4  ;;  %s48_s22 = int_to_ptr.vmem [resolvable:$true] %s47_s22  ;;  %s71_s25 = int_to_ptr.hbm [resolvable:$true] %s70_s25 }
   0xe   :  { %50 = dma.hbm_to_vmem [thread:$0]  %s46_s20, 128, %s48_s22, [#allocation6]  }
   0xf   :  { %s5446_s0 = smov [#allocation10]   ;;  %s5447_s27 = smov 64  }
  0x10   :  { %s72_s26 = sshll.u32 %s5446_s0, 4  ;;  %s5448_s28 = smov 4   ;;  %s73_s26 = int_to_ptr.vmem [resolvable:$true] %s72_s26 }
  0x11   :  { %78 = dma.hbm_to_vmem [thread:$0]  %s71_s25, 2048, %s73_s26, [#allocation9], %s5447_s27, %s5447_s27, %s5448_s28  }
  0x12   :  { %5430 = dma.done.wait [#allocation3], 512  }
  0x13   :  { %5431 = vsyncadd [#allocation3], 4294966784 }
  0x14   :  { %5432 = dma.done.wait [#allocation6], 32896  }
  0x15   :  { %5433 = vsyncadd [#allocation6], 4294934400 }
  0x16   :  { %5434 = dma.done.wait [#allocation9], 18432  }
  0x17   :  { %5435 = vsyncadd [#allocation9], 4294948864  ;;  %v3494_v0 = vld [vmem:[#allocation5 + $0x1c0] sm:$0xf]  ;;  %s5449_s30 = smov [#allocation11]   ;;  %s3256_s11 = sshll.u32 %s5619_s7, 4  ;;  %s3257_s11 = int_to_ptr.hbm [resolvable:$true] %s3256_s11 }
  0x18   :  { %v4928_v1 = vld [vmem:[#allocation5 + $0x1dc] sm:$0xf0]  ;;  %s3254_s8 = sshll.u32 %s5449_s30, 4  ;;  %s3255_s8 = int_to_ptr.vmem [resolvable:$true] %s3254_s8 }
  0x19   :  { %v3750_v2 = vld [vmem:[#allocation5 + $0x3c0] sm:$0xf]  ;;  %v3495_v3 = vor.u32 %v4928_v1, %v3494_v0 }
  0x1a   :  { %v4992_v4 = vld [vmem:[#allocation5 + $0x3dc] sm:$0xf0] }
  0x1b   :  { %v4006_v5 = vld [vmem:[#allocation5 + $0x5c0] sm:$0xf]  ;;  %v3751_v7 = vor.u32 %v4992_v4, %v3750_v2  ;;  %1663 = vmatpush.bf16.msra.mxu0 %v3495_v3 }
  0x1c   :  { %v5056_v6 = vld [vmem:[#allocation5 + $0x5dc] sm:$0xf0] }
  0x1d   :  { %v4007_v8 = vor.u32 %v5056_v6, %v4006_v5  ;;  %v4262_v9 = vld [vmem:[#allocation5 + $0x7c0] sm:$0xf]  ;;  %1676 = vmatpush.bf16.msra.mxu1 %v3751_v7 }
  0x1e   :  { %v5120_v10 = vld [vmem:[#allocation5 + $0x7dc] sm:$0xf0] }
  0x1f   :  { %v3462_v11 = vld [vmem:[#allocation5 + $0x180] sm:$0xf]  ;;  %v4263_v12 = vor.u32 %v5120_v10, %v4262_v9  ;;  %1689 = vmatpush.bf16.msra.mxu2 %v4007_v8 }
  0x20   :  { %v4920_v13 = vld [vmem:[#allocation5 + $0x19c] sm:$0xf0] }
  0x21   :  { %v3718_v14 = vld [vmem:[#allocation5 + $0x380] sm:$0xf]  ;;  %v3463_v16 = vor.u32 %v4920_v13, %v3462_v11  ;;  %1702 = vmatpush.bf16.msra.mxu3 %v4263_v12 }
  0x22   :  { %v4984_v15 = vld [vmem:[#allocation5 + $0x39c] sm:$0xf0] }
  0x23   :  { %v3719_v17 = vor.u32 %v4984_v15, %v3718_v14  ;;  %v3974_v18 = vld [vmem:[#allocation5 + $0x580] sm:$0xf]  ;;  %1664 = vmatpush.bf16.msra.mxu0 %v3463_v16 }
  0x24   :  { %v5048_v19 = vld [vmem:[#allocation5 + $0x59c] sm:$0xf0] }
  0x25   :  { %v4230_v20 = vld [vmem:[#allocation5 + $0x780] sm:$0xf]  ;;  %v3975_v21 = vor.u32 %v5048_v19, %v3974_v18  ;;  %1677 = vmatpush.bf16.msra.mxu1 %v3719_v17 }
  0x26   :  { %v5112_v22 = vld [vmem:[#allocation5 + $0x79c] sm:$0xf0] }
  0x27   :  { %v3430_v23 = vld [vmem:[#allocation5 + $0x140] sm:$0xf]  ;;  %v4231_v25 = vor.u32 %v5112_v22, %v4230_v20  ;;  %1690 = vmatpush.bf16.msra.mxu2 %v3975_v21 }
  0x28   :  { %v4912_v24 = vld [vmem:[#allocation5 + $0x15c] sm:$0xf0] }
  0x29   :  { %v3686_v26 = vld [vmem:[#allocation5 + $0x340] sm:$0xf]  ;;  %v3431_v29 = vor.u32 %v4912_v24, %v3430_v23  ;;  %1703 = vmatpush.bf16.msra.mxu3 %v4231_v25 }
  0x2a   :  { %v4976_v27 = vld [vmem:[#allocation5 + $0x35c] sm:$0xf0] }
  0x2b   :  { %v3942_v28 = vld [vmem:[#allocation5 + $0x540] sm:$0xf]  ;;  %v3687_v33 = vor.u32 %v4976_v27, %v3686_v26  ;;  %1665 = vmatpush.bf16.msra.mxu0 %v3431_v29  ;;  %v3496_v29 = vld [vmem:[#allocation5 + $0x1e0] sm:$0xf0] }
  0x2c   :  { %v5040_v30 = vld [vmem:[#allocation5 + $0x55c] sm:$0xf0] }
  0x2d   :  { %v4198_v31 = vld [vmem:[#allocation5 + $0x740] sm:$0xf]  ;;  %v3943_v34 = vor.u32 %v5040_v30, %v3942_v28  ;;  %1678 = vmatpush.bf16.msra.mxu1 %v3687_v33  ;;  %v4924_v28 = vld [vmem:[#allocation5 + $0x1c4] sm:$0xf] }
  0x2e   :  { %v5104_v32 = vld [vmem:[#allocation5 + $0x75c] sm:$0xf0]  ;;  %v4988_v30 = vld [vmem:[#allocation5 + $0x3c4] sm:$0xf] }
  0x2f   :  { %v3398_v35 = vld [vmem:[#allocation5 + $0x100] sm:$0xf]  ;;  %v4199_v38 = vor.u32 %v5104_v32, %v4198_v31  ;;  %1691 = vmatpush.bf16.msra.mxu2 %v3943_v34  ;;  %v3752_v32 = vld [vmem:[#allocation5 + $0x3e0] sm:$0xf0] }
  0x30   :  { %v4904_v36 = vld [vmem:[#allocation5 + $0x11c] sm:$0xf0]  ;;  %v5052_v33 = vld [vmem:[#allocation5 + $0x5c4] sm:$0xf] }
  0x31   :  { %v3654_v37 = vld [vmem:[#allocation5 + $0x300] sm:$0xf]  ;;  %v3399_v44 = vor.u32 %v4904_v36, %v3398_v35  ;;  %1704 = vmatpush.bf16.msra.mxu3 %v4199_v38  ;;  %v4008_v34 = vld [vmem:[#allocation5 + $0x5e0] sm:$0xf0] }
  0x32   :  { %v4968_v39 = vld [vmem:[#allocation5 + $0x31c] sm:$0xf0]  ;;  %v4264_v38 = vld [vmem:[#allocation5 + $0x7e0] sm:$0xf0] }
  0x33   :  { %v3910_v40 = vld [vmem:[#allocation5 + $0x500] sm:$0xf]  ;;  %v3655_v45 = vor.u32 %v4968_v39, %v3654_v37  ;;  %1666 = vmatpush.bf16.msra.mxu0 %v3399_v44  ;;  %v5116_v37 = vld [vmem:[#allocation5 + $0x7c4] sm:$0xf] }
  0x34   :  { %v5032_v41 = vld [vmem:[#allocation5 + $0x51c] sm:$0xf0]  ;;  %v3464_v44 = vld [vmem:[#allocation5 + $0x1a0] sm:$0xf0] }
  0x35   :  { %v4166_v42 = vld [vmem:[#allocation5 + $0x700] sm:$0xf]  ;;  %v3911_v46 = vor.u32 %v5032_v41, %v3910_v40  ;;  %1679 = vmatpush.bf16.msra.mxu1 %v3655_v45  ;;  %v3499_v40 = vor.u32 %v4924_v28, %v3496_v29  ;;  %v3755_v41 = vor.u32 %v4988_v30, %v3752_v32  ;;  %v4980_v45 = vld [vmem:[#allocation5 + $0x384] sm:$0xf] }
  0x36   :  { %v5096_v43 = vld [vmem:[#allocation5 + $0x71c] sm:$0xf0]  ;;  %v5020_v28 = vld [vmem:[#allocation5 + $0x4c4] sm:$0xf] }
  0x37   :  { %v3366_v47 = vld [vmem:[#allocation5 + $0xc0] sm:$0xf]  ;;  %v4167_v50 = vor.u32 %v5096_v43, %v4166_v42  ;;  %1692 = vmatpush.bf16.msra.mxu2 %v3911_v46  ;;  %v4011_v42 = vor.u32 %v5052_v33, %v4008_v34  ;;  %v4916_v43 = vld [vmem:[#allocation5 + $0x184] sm:$0xf]  ;;  %v4267_v46 = vor.u32 %v5116_v37, %v4264_v38 }
  0x38   :  { %v4896_v48 = vld [vmem:[#allocation5 + $0xdc] sm:$0xf0]  ;;  %v3880_v29 = vld [vmem:[#allocation5 + $0x4e0] sm:$0xf0] }
  0x39   :  { %v3622_v49 = vld [vmem:[#allocation5 + $0x2c0] sm:$0xf]  ;;  %v3367_v56 = vor.u32 %v4896_v48, %v3366_v47  ;;  %1705 = vmatpush.bf16.msra.mxu3 %v4167_v50  ;;  %v3720_v47 = vld [vmem:[#allocation5 + $0x3a0] sm:$0xf0]  ;;  %v3883_v34 = vor.u32 %v5020_v28, %v3880_v29  ;;  %v3982_v28 = vld [vmem:[#allocation5 + $0x588] sm:$0xf] }
  0x3a   :  { %v4960_v51 = vld [vmem:[#allocation5 + $0x2dc] sm:$0xf0]  ;;  %v5044_v48 = vld [vmem:[#allocation5 + $0x584] sm:$0xf]  ;;  %v5049_v29 = vld [vmem:[#allocation5 + $0x5a4] sm:$0xf0] }
  0x3b   :  { %v3878_v52 = vld [vmem:[#allocation5 + $0x4c0] sm:$0xf]  ;;  %v3623_v57 = vor.u32 %v4960_v51, %v3622_v49  ;;  %1667 = vmatpush.bf16.msra.mxu0 %v3367_v56  ;;  %v3976_v49 = vld [vmem:[#allocation5 + $0x5a0] sm:$0xf0] }
  0x3c   :  { %v5024_v53 = vld [vmem:[#allocation5 + $0x4dc] sm:$0xf0]  ;;  %v5108_v50 = vld [vmem:[#allocation5 + $0x784] sm:$0xf] }
  0x3d   :  { %v4134_v54 = vld [vmem:[#allocation5 + $0x6c0] sm:$0xf]  ;;  %v3879_v58 = vor.u32 %v5024_v53, %v3878_v52  ;;  %1680 = vmatpush.bf16.msra.mxu1 %v3623_v57  ;;  %v4232_v51 = vld [vmem:[#allocation5 + $0x7a0] sm:$0xf0]  ;;  %v3467_v52 = vor.u32 %v4916_v43, %v3464_v44 }
  0x3e   :  { %v5088_v55 = vld [vmem:[#allocation5 + $0x6dc] sm:$0xf0]  ;;  %v4908_v53 = vld [vmem:[#allocation5 + $0x144] sm:$0xf] }
  0x3f   :  { %v3334_v59 = vld [vmem:[#allocation5 + $0x80] sm:$0xf]  ;;  %v4135_v62 = vor.u32 %v5088_v55, %v4134_v54  ;;  %1693 = vmatpush.bf16.msra.mxu2 %v3879_v58  ;;  %v3723_v54 = vor.u32 %v4980_v45, %v3720_v47  ;;  %v3979_v55 = vor.u32 %v5044_v48, %v3976_v49  ;;  %v3432_v56 = vld [vmem:[#allocation5 + $0x160] sm:$0xf0] }
  0x40   :  { %v4888_v60 = vld [vmem:[#allocation5 + $0x9c] sm:$0xf0]  ;;  %v4972_v57 = vld [vmem:[#allocation5 + $0x344] sm:$0xf] }
  0x41   :  { %v3590_v61 = vld [vmem:[#allocation5 + $0x280] sm:$0xf]  ;;  %v3335_v4 = vor.u32 %v4888_v60, %v3334_v59  ;;  %1706 = vmatpush.bf16.msra.mxu3 %v4135_v62  ;;  %v3688_v58 = vld [vmem:[#allocation5 + $0x360] sm:$0xf0]  ;;  %v4235_v59 = vor.u32 %v5108_v50, %v4232_v51 }
  0x42   :  { %v4952_v63 = vld [vmem:[#allocation5 + $0x29c] sm:$0xf0]  ;;  %v5036_v60 = vld [vmem:[#allocation5 + $0x544] sm:$0xf] }
  0x43   :  { %v3846_v0 = vld [vmem:[#allocation5 + $0x480] sm:$0xf]  ;;  %v3591_v5 = vor.u32 %v4952_v63, %v3590_v61  ;;  %1668 = vmatpush.bf16.msra.mxu0 %v3335_v4  ;;  %v3944_v61 = vld [vmem:[#allocation5 + $0x560] sm:$0xf0] }
  0x44   :  { %v5016_v1 = vld [vmem:[#allocation5 + $0x49c] sm:$0xf0]  ;;  %v5100_v62 = vld [vmem:[#allocation5 + $0x744] sm:$0xf] }
  0x45   :  { %v4102_v2 = vld [vmem:[#allocation5 + $0x680] sm:$0xf]  ;;  %v3847_v6 = vor.u32 %v5016_v1, %v3846_v0  ;;  %1681 = vmatpush.bf16.msra.mxu1 %v3591_v5  ;;  %v4200_v63 = vld [vmem:[#allocation5 + $0x760] sm:$0xf0]  ;;  %v3435_v0 = vor.u32 %v4908_v53, %v3432_v56  ;;  %v3691_v1 = vor.u32 %v4972_v57, %v3688_v58  ;;  %v3947_v5 = vor.u32 %v5036_v60, %v3944_v61 }
  0x46   :  { %v5080_v3 = vld [vmem:[#allocation5 + $0x69c] sm:$0xf0]  ;;  %v5084_v30 = vld [vmem:[#allocation5 + $0x6c4] sm:$0xf] }
  0x47   :  { %v3302_v7 = vld [vmem:[#allocation5 + $0x40] sm:$0xf]  ;;  %v4103_v10 = vor.u32 %v5080_v3, %v4102_v2  ;;  %1694 = vmatpush.bf16.msra.mxu2 %v3847_v6  ;;  %v4900_v2 = vld [vmem:[#allocation5 + $0x104] sm:$0xf]  ;;  %v103_v3 = vld [vmem:[#allocation2 + $0x10] sm:$0xff] }
  0x48   :  { %v4880_v8 = vld [vmem:[#allocation5 + $0x5c] sm:$0xf0]  ;;  %v3400_v6 = vld [vmem:[#allocation5 + $0x120] sm:$0xf0] }
  0x49   :  { %v3558_v9 = vld [vmem:[#allocation5 + $0x240] sm:$0xf]  ;;  %v3303_v16 = vor.u32 %v4880_v8, %v3302_v7  ;;  %1707 = vmatpush.bf16.msra.mxu3 %v4103_v10  ;;  %v4964_v7 = vld [vmem:[#allocation5 + $0x304] sm:$0xf]  ;;  %v5505_v8 = vpack.c.bf16 %v103_v3, %v103_v3  ;;  %v104_v10 = vld [vmem:[#allocation2 + $0x18] sm:$0xff] }
  0x4a   :  { %v4944_v11 = vld [vmem:[#allocation5 + $0x25c] sm:$0xf0]  ;;  %v4948_v37 = vld [vmem:[#allocation5 + $0x284] sm:$0xf] }
  0x4b   :  { %v3814_v12 = vld [vmem:[#allocation5 + $0x440] sm:$0xf]  ;;  %v3559_v19 = vor.u32 %v4944_v11, %v3558_v9  ;;  %1669 = vmatpush.bf16.msra.mxu0 %v3303_v16  ;;  %v4203_v11 = vor.u32 %v5100_v62, %v4200_v63  ;;  %v5092_v16 = vld [vmem:[#allocation5 + $0x704] sm:$0xf] }
  0x4c   :  { %v5008_v13 = vld [vmem:[#allocation5 + $0x45c] sm:$0xf0]  ;;  %v4104_v43 = vld [vmem:[#allocation5 + $0x6a0] sm:$0xf0] }
  0x4d   :  { %v4070_v14 = vld [vmem:[#allocation5 + $0x640] sm:$0xf]  ;;  %v3815_v20 = vor.u32 %v5008_v13, %v3814_v12  ;;  %1682 = vmatpush.bf16.msra.mxu1 %v3559_v19  ;;  %v3656_v12 = vld [vmem:[#allocation5 + $0x320] sm:$0xf0]  ;;  %v102_v19 = vld [vmem:[#allocation2 + $0x8] sm:$0xff] }
  0x4e   :  { %v5072_v15 = vld [vmem:[#allocation5 + $0x65c] sm:$0xf0]  ;;  %v5028_v13 = vld [vmem:[#allocation5 + $0x504] sm:$0xf] }
  0x4f   :  { %v3270_v17 = vld [vmem:[#allocation5] sm:$0xf]  ;;  %v4071_v24 = vor.u32 %v5072_v15, %v4070_v14  ;;  %1695 = vmatpush.bf16.msra.mxu2 %v3815_v20  ;;  %v3912_v14 = vld [vmem:[#allocation5 + $0x520] sm:$0xf0]  ;;  %v5509_v15 = vpack.c.bf16 %v104_v10, %v104_v10  ;;  %v3659_v20 = vor.u32 %v4964_v7, %v3656_v12  ;;  %v4993_v10 = vld [vmem:[#allocation5 + $0x3e4] sm:$0xf0] }
  0x50   :  { %v4872_v18 = vld [vmem:[#allocation5 + $0x1c] sm:$0xf0]  ;;  %v4876_v47 = vld [vmem:[#allocation5 + $0x44] sm:$0xf]  ;;  %v5057_v12 = vld [vmem:[#allocation5 + $0x5e4] sm:$0xf0] }
  0x51   :  { %v3526_v21 = vld [vmem:[#allocation5 + $0x200] sm:$0xf]  ;;  %v3271_v31 = vor.u32 %v4872_v18, %v3270_v17  ;;  %1708 = vmatpush.bf16.msra.mxu3 %v4071_v24  ;;  %v4168_v17 = vld [vmem:[#allocation5 + $0x720] sm:$0xf0]  ;;  %v3403_v18 = vor.u32 %v4900_v2, %v3400_v6  ;;  %v3758_v6 = vld [vmem:[#allocation5 + $0x3c8] sm:$0xf] }
  0x52   :  { %v4936_v22 = vld [vmem:[#allocation5 + $0x21c] sm:$0xf0]  ;;  %v4956_v24 = vld [vmem:[#allocation5 + $0x2c4] sm:$0xf] }
  0x53   :  { %v3782_v23 = vld [vmem:[#allocation5 + $0x400] sm:$0xf]  ;;  %v3527_v35 = vor.u32 %v4936_v22, %v3526_v21  ;;  %1670 = vmatpush.bf16.msra.mxu0 %v3271_v31  ;;  %v3915_v21 = vor.u32 %v5028_v13, %v3912_v14  ;;  %v4892_v22 = vld [vmem:[#allocation5 + $0xc4] sm:$0xf] }
  0x54   :  { %v5000_v25 = vld [vmem:[#allocation5 + $0x41c] sm:$0xf0]  ;;  %v4136_v31 = vld [vmem:[#allocation5 + $0x6e0] sm:$0xf0] }
  0x55   :  { %v4038_v26 = vld [vmem:[#allocation5 + $0x600] sm:$0xf]  ;;  %v3783_v36 = vor.u32 %v5000_v25, %v3782_v23  ;;  %1683 = vmatpush.bf16.msra.mxu1 %v3527_v35  ;;  %v3368_v23 = vld [vmem:[#allocation5 + $0xe0] sm:$0xf0]  ;;  %v5514_v25 = vpack.c.bf16 %v102_v19, %v102_v19  ;;  %v4139_v38 = vor.u32 %v5084_v30, %v4136_v31  ;;  %v4238_v30 = vld [vmem:[#allocation5 + $0x788] sm:$0xf] }
  0x56   :  { %v5064_v27 = vld [vmem:[#allocation5 + $0x61c] sm:$0xf0]  ;;  %v3371_v32 = vor.u32 %v4892_v22, %v3368_v23  ;;  %v4884_v35 = vld [vmem:[#allocation5 + $0x84] sm:$0xf]  ;;  %v3470_v22 = vld [vmem:[#allocation5 + $0x188] sm:$0xf] }
  0x57   :  { %v4039_v39 = vor.u32 %v5064_v27, %v4038_v26  ;;  %1696 = vmatpush.bf16.msra.mxu2 %v3783_v36  ;;  %1715 = vmatpush.bf16.msrb.mxu0 %v3499_v40  ;;  %v101_v4 = vld [vmem:[#allocation2] sm:$0xff]  ;;  %v4171_v26 = vor.u32 %v5092_v16, %v4168_v17  ;;  %v4270_v16 = vld [vmem:[#allocation5 + $0x7c8] sm:$0xf] }
  0x58   :  { %v5507_v9 = vpack.c.bf16 %v101_v4, %v101_v4  ;;  %v3624_v27 = vld [vmem:[#allocation5 + $0x2e0] sm:$0xf0]  ;;  %1684 = vmatmul.bf16.vlgmr.msra.gmra.mxu1 %v5514_v25  ;;  %v3502_v4 = vld [vmem:[#allocation5 + $0x1c8] sm:$0xf] }
  0x59   :  { %1709 = vmatpush.bf16.msra.mxu3 %v4039_v39  ;;  %1728 = vmatpush.bf16.msrb.mxu1 %v3755_v41  ;;  %v3627_v33 = vor.u32 %v4956_v24, %v3624_v27  ;;  %v3336_v36 = vld [vmem:[#allocation5 + $0xa0] sm:$0xf0]  ;;  %v5121_v17 = vld [vmem:[#allocation5 + $0x7e4] sm:$0xf0] }
  0x5a   :  { %1697 = vmatmul.bf16.vlgmr.msra.gmra.mxu2 %v5505_v8  ;;  %1671 = vmatmul.bf16.vlgmr.msra.gmra.mxu0 %v5507_v9  ;;  %v3592_v39 = vld [vmem:[#allocation5 + $0x2a0] sm:$0xf0]  ;;  %v3339_v44 = vor.u32 %v4884_v35, %v3336_v36  ;;  %v4921_v23 = vld [vmem:[#allocation5 + $0x1a4] sm:$0xf0] }
  0x5b   :  { %1741 = vmatpush.bf16.msrb.mxu2 %v4011_v42  ;;  %1716 = vmatpush.bf16.msrb.mxu0 %v3467_v52  ;;  %v5012_v40 = vld [vmem:[#allocation5 + $0x484] sm:$0xf]  ;;  %v3595_v45 = vor.u32 %v4948_v37, %v3592_v39  ;;  %v3726_v24 = vld [vmem:[#allocation5 + $0x388] sm:$0xf] }
  0x5c   :  { %1710 = vmatmul.bf16.vlgmr.msra.gmra.mxu3 %v5509_v15  ;;  %v3848_v41 = vld [vmem:[#allocation5 + $0x4a0] sm:$0xf0]  ;;  %v4985_v27 = vld [vmem:[#allocation5 + $0x3a4] sm:$0xf0] }
  0x5d   :  { %1754 = vmatpush.bf16.msrb.mxu3 %v4267_v46  ;;  %1729 = vmatpush.bf16.msrb.mxu1 %v3723_v54  ;;  %v5076_v42 = vld [vmem:[#allocation5 + $0x684] sm:$0xf]  ;;  %v3851_v46 = vor.u32 %v5012_v40, %v3848_v41  ;;  %v5113_v31 = vld [vmem:[#allocation5 + $0x7a4] sm:$0xf0] }
  0x5e   :  { %v3304_v48 = vld [vmem:[#allocation5 + $0x60] sm:$0xf0]  ;;  %v4107_v50 = vor.u32 %v5076_v42, %v4104_v43  ;;  %v3438_v35 = vld [vmem:[#allocation5 + $0x148] sm:$0xf] }
  0x5f   :  { %1742 = vmatpush.bf16.msrb.mxu2 %v3979_v55  ;;  %1717 = vmatpush.bf16.msrb.mxu0 %v3435_v0  ;;  %v4940_v49 = vld [vmem:[#allocation5 + $0x244] sm:$0xf]  ;;  %v3307_v56 = vor.u32 %v4876_v47, %v3304_v48  ;;  %v4913_v36 = vld [vmem:[#allocation5 + $0x164] sm:$0xf0] }
  0x60   :  { %v3560_v51 = vld [vmem:[#allocation5 + $0x260] sm:$0xf0]  ;;  %v3694_v37 = vld [vmem:[#allocation5 + $0x348] sm:$0xf] }
  0x61   :  { %1755 = vmatpush.bf16.msrb.mxu3 %v4235_v59  ;;  %1730 = vmatpush.bf16.msrb.mxu1 %v3691_v1  ;;  %v5004_v52 = vld [vmem:[#allocation5 + $0x444] sm:$0xf]  ;;  %v3563_v59 = vor.u32 %v4940_v49, %v3560_v51  ;;  %v4977_v39 = vld [vmem:[#allocation5 + $0x364] sm:$0xf0] }
  0x62   :  { %v3816_v53 = vld [vmem:[#allocation5 + $0x460] sm:$0xf0]  ;;  %v3950_v40 = vld [vmem:[#allocation5 + $0x548] sm:$0xf] }
  0x63   :  { %1743 = vmatpush.bf16.msrb.mxu2 %v3947_v5  ;;  %1718 = vmatpush.bf16.msrb.mxu0 %v3403_v18  ;;  %v5068_v54 = vld [vmem:[#allocation5 + $0x644] sm:$0xf]  ;;  %v3819_v60 = vor.u32 %v5004_v52, %v3816_v53  ;;  %v4929_v5 = vld [vmem:[#allocation5 + $0x1e4] sm:$0xf0] }
  0x64   :  { %v4072_v55 = vld [vmem:[#allocation5 + $0x660] sm:$0xf0]  ;;  %v3503_v19 = vor.u32 %v4929_v5, %v3502_v4  ;;  %v5041_v41 = vld [vmem:[#allocation5 + $0x564] sm:$0xf0] }
  0x65   :  { %1756 = vmatpush.bf16.msrb.mxu3 %v4203_v11  ;;  %1731 = vmatpush.bf16.msrb.mxu1 %v3659_v20  ;;  %v4868_v57 = vld [vmem:[#allocation5 + $0x4] sm:$0xf]  ;;  %v4075_v0 = vor.u32 %v5068_v54, %v4072_v55  ;;  %v4014_v11 = vld [vmem:[#allocation5 + $0x5c8] sm:$0xf]  ;;  %v3759_v20 = vor.u32 %v4993_v10, %v3758_v6 }
  0x66   :  { %v3272_v58 = vld [vmem:[#allocation5 + $0x20] sm:$0xf0]  ;;  %v4206_v42 = vld [vmem:[#allocation5 + $0x748] sm:$0xf] }
  0x67   :  { %1744 = vmatpush.bf16.msrb.mxu2 %v3915_v21  ;;  %1719 = vmatpush.bf16.msrb.mxu0 %v3371_v32  ;;  %v4932_v61 = vld [vmem:[#allocation5 + $0x204] sm:$0xf]  ;;  %v3275_v7 = vor.u32 %v4868_v57, %v3272_v58  ;;  %v4015_v21 = vor.u32 %v5057_v12, %v4014_v11  ;;  %v3471_v32 = vor.u32 %v4921_v23, %v3470_v22  ;;  %v5105_v43 = vld [vmem:[#allocation5 + $0x764] sm:$0xf0] }
  0x68   :  { %v3528_v62 = vld [vmem:[#allocation5 + $0x220] sm:$0xf0]  ;;  %v3406_v47 = vld [vmem:[#allocation5 + $0x108] sm:$0xf] }
  0x69   :  { %1757 = vmatpush.bf16.msrb.mxu3 %v4171_v26  ;;  %1732 = vmatpush.bf16.msrb.mxu1 %v3627_v33  ;;  %v4996_v63 = vld [vmem:[#allocation5 + $0x404] sm:$0xf]  ;;  %v3531_v13 = vor.u32 %v4932_v61, %v3528_v62  ;;  %v4271_v26 = vor.u32 %v5121_v17, %v4270_v16  ;;  %v3727_v33 = vor.u32 %v4985_v27, %v3726_v24  ;;  %v4905_v48 = vld [vmem:[#allocation5 + $0x124] sm:$0xf0] }
  0x6a   :  { %v3784_v1 = vld [vmem:[#allocation5 + $0x420] sm:$0xf0]  ;;  %v3662_v49 = vld [vmem:[#allocation5 + $0x308] sm:$0xf] }
  0x6b   :  { %1745 = vmatpush.bf16.msrb.mxu2 %v3883_v34  ;;  %1720 = vmatpush.bf16.msrb.mxu0 %v3339_v44  ;;  %v5060_v2 = vld [vmem:[#allocation5 + $0x604] sm:$0xf]  ;;  %v3787_v14 = vor.u32 %v4996_v63, %v3784_v1  ;;  %v3983_v34 = vor.u32 %v5049_v29, %v3982_v28  ;;  %v3439_v44 = vor.u32 %v4913_v36, %v3438_v35  ;;  %v4969_v51 = vld [vmem:[#allocation5 + $0x324] sm:$0xf0] }
  0x6c   :  { %v4040_v3 = vld [vmem:[#allocation5 + $0x620] sm:$0xf0]  ;;  %v3918_v52 = vld [vmem:[#allocation5 + $0x508] sm:$0xf]  ;;  %v3663_v57 = vor.u32 %v4969_v51, %v3662_v49  ;;  %v5053_v49 = vld [vmem:[#allocation5 + $0x5cc] sm:$0xf] }
  0x6d   :  { %1758 = vmatpush.bf16.msrb.mxu3 %v4139_v38  ;;  %1733 = vmatpush.bf16.msrb.mxu1 %v3595_v45  ;;  %v4043_v18 = vor.u32 %v5060_v2, %v4040_v3  ;;  %v4239_v38 = vor.u32 %v5113_v31, %v4238_v30  ;;  %v3695_v45 = vor.u32 %v4977_v39, %v3694_v37  ;;  %v5033_v53 = vld [vmem:[#allocation5 + $0x524] sm:$0xf0] }
  0x6e   :  { %v4174_v54 = vld [vmem:[#allocation5 + $0x708] sm:$0xf]  ;;  %v3919_v58 = vor.u32 %v5033_v53, %v3918_v52  ;;  %v5117_v53 = vld [vmem:[#allocation5 + $0x7cc] sm:$0xf] }
  0x6f   :  { %1746 = vmatpush.bf16.msrb.mxu2 %v3851_v46  ;;  %1721 = vmatpush.bf16.msrb.mxu0 %v3307_v56  ;;  %v3951_v46 = vor.u32 %v5041_v41, %v3950_v40  ;;  %v5097_v55 = vld [vmem:[#allocation5 + $0x724] sm:$0xf0]  ;;  %v3407_v56 = vor.u32 %v4905_v48, %v3406_v47  ;;  %v3760_v48 = vld [vmem:[#allocation5 + $0x3e8] sm:$0xf0] }
  0x70   :  { %v3630_v61 = vld [vmem:[#allocation5 + $0x2c8] sm:$0xf]  ;;  %v4175_v62 = vor.u32 %v5097_v55, %v4174_v54  ;;  %v4272_v54 = vld [vmem:[#allocation5 + $0x7e8] sm:$0xf0] }
  0x71   :  { %1759 = vmatpush.bf16.msrb.mxu3 %v4107_v50  ;;  %1734 = vmatpush.bf16.msrb.mxu1 %v3563_v59  ;;  %v4207_v50 = vor.u32 %v5105_v43, %v4206_v42  ;;  %v3374_v59 = vld [vmem:[#allocation5 + $0xc8] sm:$0xf] }
  0x72   :  { %v4961_v63 = vld [vmem:[#allocation5 + $0x2e4] sm:$0xf0] }
  0x73   :  { %1747 = vmatpush.bf16.msrb.mxu2 %v3819_v60  ;;  %1722 = vmatpush.bf16.msrb.mxu0 %v3275_v7  ;;  %v4897_v60 = vld [vmem:[#allocation5 + $0xe4] sm:$0xf0]  ;;  %v3631_v5 = vor.u32 %v4961_v63, %v3630_v61  ;;  %v4981_v61 = vld [vmem:[#allocation5 + $0x38c] sm:$0xf] }
  0x74   :  { %v5025_v1 = vld [vmem:[#allocation5 + $0x4e4] sm:$0xf0]  ;;  %v3375_v4 = vor.u32 %v4897_v60, %v3374_v59  ;;  %v4917_v59 = vld [vmem:[#allocation5 + $0x18c] sm:$0xf] }
  0x75   :  { %1760 = vmatpush.bf16.msrb.mxu3 %v4075_v0  ;;  %1735 = vmatpush.bf16.msrb.mxu1 %v3531_v13  ;;  %v3886_v0 = vld [vmem:[#allocation5 + $0x4c8] sm:$0xf]  ;;  %v3472_v60 = vld [vmem:[#allocation5 + $0x1a8] sm:$0xf0] }
  0x76   :  { %1723 = vmatmul.bf16.vlgmr.msrb.gmra.mxu0 %v5507_v9  ;;  %v4142_v2 = vld [vmem:[#allocation5 + $0x6c8] sm:$0xf]  ;;  %v3887_v6 = vor.u32 %v5025_v1, %v3886_v0  ;;  %v3728_v63 = vld [vmem:[#allocation5 + $0x3a8] sm:$0xf0] }
  0x77   :  { %1748 = vmatpush.bf16.msrb.mxu2 %v3787_v14  ;;  %1767 = vmatpush.bf16.msra.mxu0 %v3503_v19  ;;  %v5089_v3 = vld [vmem:[#allocation5 + $0x6e4] sm:$0xf0]  ;;  %v5045_v0 = vld [vmem:[#allocation5 + $0x58c] sm:$0xf] }
  0x78   :  { %1736 = vmatmul.bf16.vlgmr.msrb.gmra.mxu1 %v5514_v25  ;;  %v3342_v7 = vld [vmem:[#allocation5 + $0x88] sm:$0xf]  ;;  %v4143_v12 = vor.u32 %v5089_v3, %v4142_v2  ;;  %v3984_v1 = vld [vmem:[#allocation5 + $0x5a8] sm:$0xf0] }
  0x79   :  { %1761 = vmatpush.bf16.msrb.mxu3 %v4043_v18  ;;  %1780 = vmatpush.bf16.msra.mxu1 %v3759_v20  ;;  %v4889_v10 = vld [vmem:[#allocation5 + $0xa4] sm:$0xf0]  ;;  %v5109_v2 = vld [vmem:[#allocation5 + $0x78c] sm:$0xf] }
  0x7a   :  { %1749 = vmatmul.bf16.vlgmr.msrb.gmra.mxu2 %v5505_v8  ;;  %v3598_v11 = vld [vmem:[#allocation5 + $0x288] sm:$0xf]  ;;  %v3343_v19 = vor.u32 %v4889_v10, %v3342_v7  ;;  %v4240_v3 = vld [vmem:[#allocation5 + $0x7a8] sm:$0xf0] }
  0x7b   :  { %1793 = vmatpush.bf16.msra.mxu2 %v4015_v21  ;;  %1768 = vmatpush.bf16.msra.mxu0 %v3471_v32  ;;  %v4953_v13 = vld [vmem:[#allocation5 + $0x2a4] sm:$0xf0]  ;;  %v4909_v7 = vld [vmem:[#allocation5 + $0x14c] sm:$0xf] }
  0x7c   :  { %1762 = vmatmul.bf16.vlgmr.msrb.gmra.mxu3 %v5509_v15  ;;  %v3854_v14 = vld [vmem:[#allocation5 + $0x488] sm:$0xf]  ;;  %v3599_v20 = vor.u32 %v4953_v13, %v3598_v11  ;;  %v3440_v10 = vld [vmem:[#allocation5 + $0x168] sm:$0xf0] }
  0x7d   :  { %1806 = vmatpush.bf16.msra.mxu3 %v4271_v26  ;;  %1781 = vmatpush.bf16.msra.mxu1 %v3727_v33  ;;  %v5017_v16 = vld [vmem:[#allocation5 + $0x4a4] sm:$0xf0]  ;;  %v4973_v11 = vld [vmem:[#allocation5 + $0x34c] sm:$0xf] }
  0x7e   :  { %v4110_v17 = vld [vmem:[#allocation5 + $0x688] sm:$0xf]  ;;  %v3855_v21 = vor.u32 %v5017_v16, %v3854_v14  ;;  %v3696_v13 = vld [vmem:[#allocation5 + $0x368] sm:$0xf0] }
  0x7f   :  { %1794 = vmatpush.bf16.msra.mxu2 %v3983_v34  ;;  %1769 = vmatpush.bf16.msra.mxu0 %v3439_v44  ;;  %v5081_v18 = vld [vmem:[#allocation5 + $0x6a4] sm:$0xf0]  ;;  %v4925_v44 = vld [vmem:[#allocation5 + $0x1cc] sm:$0xf] }
  0x80   :  { %v3310_v22 = vld [vmem:[#allocation5 + $0x48] sm:$0xf]  ;;  %v4111_v26 = vor.u32 %v5081_v18, %v4110_v17  ;;  %v5037_v14 = vld [vmem:[#allocation5 + $0x54c] sm:$0xf] }
  0x81   :  { %1807 = vmatpush.bf16.msra.mxu3 %v4239_v38  ;;  %1782 = vmatpush.bf16.msra.mxu1 %v3695_v45  ;;  %v4881_v23 = vld [vmem:[#allocation5 + $0x64] sm:$0xf0]  ;;  %v3504_v45 = vld [vmem:[#allocation5 + $0x1e8] sm:$0xf0] }
  0x82   :  { %v3566_v24 = vld [vmem:[#allocation5 + $0x248] sm:$0xf]  ;;  %v3311_v32 = vor.u32 %v4881_v23, %v3310_v22  ;;  %v3952_v16 = vld [vmem:[#allocation5 + $0x568] sm:$0xf0] }
  0x83   :  { %1795 = vmatpush.bf16.msra.mxu2 %v3951_v46  ;;  %1770 = vmatpush.bf16.msra.mxu0 %v3407_v56  ;;  %v4945_v27 = vld [vmem:[#allocation5 + $0x264] sm:$0xf0]  ;;  %v4989_v46 = vld [vmem:[#allocation5 + $0x3cc] sm:$0xf]  ;;  %v3507_v56 = vor.u32 %v4925_v44, %v3504_v45 }
  0x84   :  { %v3822_v28 = vld [vmem:[#allocation5 + $0x448] sm:$0xf]  ;;  %v3567_v35 = vor.u32 %v4945_v27, %v3566_v24  ;;  %v5101_v17 = vld [vmem:[#allocation5 + $0x74c] sm:$0xf] }
  0x85   :  { %1808 = vmatpush.bf16.msra.mxu3 %v4207_v50  ;;  %1783 = vmatpush.bf16.msra.mxu1 %v3663_v57  ;;  %v5009_v29 = vld [vmem:[#allocation5 + $0x464] sm:$0xf0]  ;;  %v4016_v50 = vld [vmem:[#allocation5 + $0x5e8] sm:$0xf0]  ;;  %v3763_v57 = vor.u32 %v4989_v46, %v3760_v48 }
  0x86   :  { %v4078_v30 = vld [vmem:[#allocation5 + $0x648] sm:$0xf]  ;;  %v3823_v36 = vor.u32 %v5009_v29, %v3822_v28  ;;  %v4208_v18 = vld [vmem:[#allocation5 + $0x768] sm:$0xf0] }
  0x87   :  { %1796 = vmatpush.bf16.msra.mxu2 %v3919_v58  ;;  %1771 = vmatpush.bf16.msra.mxu0 %v3375_v4  ;;  %v5073_v31 = vld [vmem:[#allocation5 + $0x664] sm:$0xf0]  ;;  %v4019_v58 = vor.u32 %v5053_v49, %v4016_v50  ;;  %v3475_v4 = vor.u32 %v4917_v59, %v3472_v60  ;;  %v4901_v22 = vld [vmem:[#allocation5 + $0x10c] sm:$0xf] }
  0x88   :  { %v3278_v33 = vld [vmem:[#allocation5 + $0x8] sm:$0xf]  ;;  %v4079_v40 = vor.u32 %v5073_v31, %v4078_v30  ;;  %v3408_v23 = vld [vmem:[#allocation5 + $0x128] sm:$0xf0] }
  0x89   :  { %1809 = vmatpush.bf16.msra.mxu3 %v4175_v62  ;;  %1784 = vmatpush.bf16.msra.mxu1 %v3631_v5  ;;  %v4873_v34 = vld [vmem:[#allocation5 + $0x24] sm:$0xf0]  ;;  %v4275_v62 = vor.u32 %v5117_v53, %v4272_v54  ;;  %v3731_v5 = vor.u32 %v4981_v61, %v3728_v63  ;;  %v4965_v24 = vld [vmem:[#allocation5 + $0x30c] sm:$0xf] }
  0x8a   :  { %v3534_v37 = vld [vmem:[#allocation5 + $0x208] sm:$0xf]  ;;  %v3279_v47 = vor.u32 %v4873_v34, %v3278_v33  ;;  %v3664_v27 = vld [vmem:[#allocation5 + $0x328] sm:$0xf0] }
  0x8b   :  { %1797 = vmatpush.bf16.msra.mxu2 %v3887_v6  ;;  %1772 = vmatpush.bf16.msra.mxu0 %v3343_v19  ;;  %v4937_v38 = vld [vmem:[#allocation5 + $0x224] sm:$0xf0]  ;;  %v3987_v6 = vor.u32 %v5045_v0, %v3984_v1  ;;  %v3443_v19 = vor.u32 %v4909_v7, %v3440_v10  ;;  %v5029_v28 = vld [vmem:[#allocation5 + $0x50c] sm:$0xf]  ;;  %v3667_v33 = vor.u32 %v4965_v24, %v3664_v27  ;;  %v4022_v24 = vld [vmem:[#allocation5 + $0x5d0] sm:$0xf] }
  0x8c   :  { %v3790_v39 = vld [vmem:[#allocation5 + $0x408] sm:$0xf]  ;;  %v3535_v51 = vor.u32 %v4937_v38, %v3534_v37  ;;  %v3920_v29 = vld [vmem:[#allocation5 + $0x528] sm:$0xf0] }
  0x8d   :  { %1810 = vmatpush.bf16.msra.mxu3 %v4143_v12  ;;  %1785 = vmatpush.bf16.msra.mxu1 %v3599_v20  ;;  %v5001_v41 = vld [vmem:[#allocation5 + $0x424] sm:$0xf0]  ;;  %v4243_v12 = vor.u32 %v5109_v2, %v4240_v3  ;;  %v3699_v20 = vor.u32 %v4973_v11, %v3696_v13  ;;  %v5093_v30 = vld [vmem:[#allocation5 + $0x70c] sm:$0xf]  ;;  %v3923_v34 = vor.u32 %v5029_v28, %v3920_v29  ;;  %v4278_v29 = vld [vmem:[#allocation5 + $0x7d0] sm:$0xf] }
  0x8e   :  { %v4046_v42 = vld [vmem:[#allocation5 + $0x608] sm:$0xf]  ;;  %v3791_v52 = vor.u32 %v5001_v41, %v3790_v39  ;;  %v4176_v31 = vld [vmem:[#allocation5 + $0x728] sm:$0xf0] }
  0x8f   :  { %1798 = vmatpush.bf16.msra.mxu2 %v3855_v21  ;;  %v5065_v43 = vld [vmem:[#allocation5 + $0x624] sm:$0xf0]  ;;  %1773 = vmatpush.bf16.msra.mxu0 %v3311_v32  ;;  %v3955_v21 = vor.u32 %v5037_v14, %v3952_v16  ;;  %v3411_v32 = vor.u32 %v4901_v22, %v3408_v23  ;;  %v4957_v37 = vld [vmem:[#allocation5 + $0x2cc] sm:$0xf]  ;;  %v4179_v38 = vor.u32 %v5093_v30, %v4176_v31  ;;  %v4994_v23 = vld [vmem:[#allocation5 + $0x3ec] sm:$0xf0] }
  0x90   :  { %v4047_v55 = vor.u32 %v5065_v43, %v4046_v42  ;;  %v3632_v39 = vld [vmem:[#allocation5 + $0x2e8] sm:$0xf0]  ;;  %v5122_v30 = vld [vmem:[#allocation5 + $0x7ec] sm:$0xf0] }
  0x91   :  { %1811 = vmatpush.bf16.msra.mxu3 %v4111_v26  ;;  %1786 = vmatpush.bf16.msra.mxu1 %v3567_v35  ;;  %v4211_v26 = vor.u32 %v5101_v17, %v4208_v18  ;;  %v4893_v35 = vld [vmem:[#allocation5 + $0xcc] sm:$0xf]  ;;  %v3635_v45 = vor.u32 %v4957_v37, %v3632_v39  ;;  %v3734_v37 = vld [vmem:[#allocation5 + $0x390] sm:$0xf] }
  0x92   :  { %v3888_v41 = vld [vmem:[#allocation5 + $0x4e8] sm:$0xf0]  ;;  %v4986_v39 = vld [vmem:[#allocation5 + $0x3ac] sm:$0xf0] }
  0x93   :  { %1799 = vmatpush.bf16.msra.mxu2 %v3823_v36  ;;  %1774 = vmatpush.bf16.msra.mxu0 %v3279_v47  ;;  %v3376_v36 = vld [vmem:[#allocation5 + $0xe8] sm:$0xf0] }
  0x94   :  { %v5085_v42 = vld [vmem:[#allocation5 + $0x6cc] sm:$0xf]  ;;  %v3379_v44 = vor.u32 %v4893_v35, %v3376_v36  ;;  %v3478_v35 = vld [vmem:[#allocation5 + $0x190] sm:$0xf] }
  0x95   :  { %1812 = vmatpush.bf16.msra.mxu3 %v4079_v40  ;;  %1787 = vmatpush.bf16.msra.mxu1 %v3535_v51  ;;  %v5021_v40 = vld [vmem:[#allocation5 + $0x4cc] sm:$0xf]  ;;  %v4922_v36 = vld [vmem:[#allocation5 + $0x1ac] sm:$0xf0] }
  0x96   :  { %1775 = vmatmul.bf16.vlgmr.msra.gmra.mxu0 %v5507_v9  ;;  %v4144_v43 = vld [vmem:[#allocation5 + $0x6e8] sm:$0xf0]  ;;  %v3891_v46 = vor.u32 %v5021_v40, %v3888_v41  ;;  %v3990_v40 = vld [vmem:[#allocation5 + $0x590] sm:$0xf] }
  0x97   :  { %1800 = vmatpush.bf16.msra.mxu2 %v3791_v52  ;;  %1819 = vmatpush.bf16.msrb.mxu0 %v3507_v56  ;;  %v4885_v47 = vld [vmem:[#allocation5 + $0x8c] sm:$0xf]  ;;  %v4147_v50 = vor.u32 %v5085_v42, %v4144_v43  ;;  %v5050_v41 = vld [vmem:[#allocation5 + $0x5ac] sm:$0xf0] }
  0x98   :  { %1788 = vmatmul.bf16.vlgmr.msra.gmra.mxu1 %v5514_v25  ;;  %v3344_v48 = vld [vmem:[#allocation5 + $0xa8] sm:$0xf0]  ;;  %v4246_v42 = vld [vmem:[#allocation5 + $0x790] sm:$0xf] }
  0x99   :  { %1813 = vmatpush.bf16.msra.mxu3 %v4047_v55  ;;  %1832 = vmatpush.bf16.msrb.mxu1 %v3763_v57  ;;  %v4949_v49 = vld [vmem:[#allocation5 + $0x28c] sm:$0xf]  ;;  %v3347_v56 = vor.u32 %v4885_v47, %v3344_v48  ;;  %v5114_v43 = vld [vmem:[#allocation5 + $0x7ac] sm:$0xf0] }
  0x9a   :  { %1801 = vmatmul.bf16.vlgmr.msra.gmra.mxu2 %v5505_v8  ;;  %v3600_v51 = vld [vmem:[#allocation5 + $0x2a8] sm:$0xf0]  ;;  %v3446_v47 = vld [vmem:[#allocation5 + $0x150] sm:$0xf] }
  0x9b   :  { %1845 = vmatpush.bf16.msrb.mxu2 %v4019_v58  ;;  %1820 = vmatpush.bf16.msrb.mxu0 %v3475_v4  ;;  %v5013_v52 = vld [vmem:[#allocation5 + $0x48c] sm:$0xf]  ;;  %v3603_v57 = vor.u32 %v4949_v49, %v3600_v51  ;;  %v4914_v48 = vld [vmem:[#allocation5 + $0x16c] sm:$0xf0] }
  0x9c   :  { %1814 = vmatmul.bf16.vlgmr.msra.gmra.mxu3 %v5509_v15  ;;  %v3856_v53 = vld [vmem:[#allocation5 + $0x4a8] sm:$0xf0]  ;;  %v3702_v49 = vld [vmem:[#allocation5 + $0x350] sm:$0xf] }
  0x9d   :  { %1858 = vmatpush.bf16.msrb.mxu3 %v4275_v62  ;;  %1833 = vmatpush.bf16.msrb.mxu1 %v3731_v5  ;;  %v5077_v54 = vld [vmem:[#allocation5 + $0x68c] sm:$0xf]  ;;  %v3859_v58 = vor.u32 %v5013_v52, %v3856_v53  ;;  %v4978_v51 = vld [vmem:[#allocation5 + $0x36c] sm:$0xf0] }
  0x9e   :  { %v4112_v55 = vld [vmem:[#allocation5 + $0x6a8] sm:$0xf0]  ;;  %v3958_v52 = vld [vmem:[#allocation5 + $0x550] sm:$0xf] }
  0x9f   :  { %1846 = vmatpush.bf16.msrb.mxu2 %v3987_v6  ;;  %1821 = vmatpush.bf16.msrb.mxu0 %v3443_v19  ;;  %v4877_v59 = vld [vmem:[#allocation5 + $0x4c] sm:$0xf]  ;;  %v4115_v62 = vor.u32 %v5077_v54, %v4112_v55  ;;  %v3510_v19 = vld [vmem:[#allocation5 + $0x1d0] sm:$0xf] }
  0xa0   :  { %v3312_v60 = vld [vmem:[#allocation5 + $0x68] sm:$0xf0]  ;;  %v5042_v53 = vld [vmem:[#allocation5 + $0x56c] sm:$0xf0] }
  0xa1   :  { %1859 = vmatpush.bf16.msrb.mxu3 %v4243_v12  ;;  %1834 = vmatpush.bf16.msrb.mxu1 %v3699_v20  ;;  %v4941_v61 = vld [vmem:[#allocation5 + $0x24c] sm:$0xf]  ;;  %v3315_v4 = vor.u32 %v4877_v59, %v3312_v60  ;;  %v4930_v20 = vld [vmem:[#allocation5 + $0x1ec] sm:$0xf0] }
  0xa2   :  { %v3568_v63 = vld [vmem:[#allocation5 + $0x268] sm:$0xf0]  ;;  %v4214_v54 = vld [vmem:[#allocation5 + $0x750] sm:$0xf] }
  0xa3   :  { %1847 = vmatpush.bf16.msrb.mxu2 %v3955_v21  ;;  %1822 = vmatpush.bf16.msrb.mxu0 %v3411_v32  ;;  %v5005_v0 = vld [vmem:[#allocation5 + $0x44c] sm:$0xf]  ;;  %v3571_v7 = vor.u32 %v4941_v61, %v3568_v63  ;;  %v3766_v21 = vld [vmem:[#allocation5 + $0x3d0] sm:$0xf]  ;;  %v3511_v32 = vor.u32 %v4930_v20, %v3510_v19 }
  0xa4   :  { %v3824_v1 = vld [vmem:[#allocation5 + $0x468] sm:$0xf0]  ;;  %v5106_v55 = vld [vmem:[#allocation5 + $0x76c] sm:$0xf0] }
  0xa5   :  { %1860 = vmatpush.bf16.msrb.mxu3 %v4211_v26  ;;  %1835 = vmatpush.bf16.msrb.mxu1 %v3667_v33  ;;  %v5069_v2 = vld [vmem:[#allocation5 + $0x64c] sm:$0xf]  ;;  %v3827_v10 = vor.u32 %v5005_v0, %v3824_v1  ;;  %v5058_v26 = vld [vmem:[#allocation5 + $0x5ec] sm:$0xf0]  ;;  %v3767_v33 = vor.u32 %v4994_v23, %v3766_v21 }
  0xa6   :  { %v4080_v3 = vld [vmem:[#allocation5 + $0x668] sm:$0xf0]  ;;  %v3414_v59 = vld [vmem:[#allocation5 + $0x110] sm:$0xf] }
  0xa7   :  { %1848 = vmatpush.bf16.msrb.mxu2 %v3923_v34  ;;  %1823 = vmatpush.bf16.msrb.mxu0 %v3379_v44  ;;  %v4869_v5 = vld [vmem:[#allocation5 + $0xc] sm:$0xf]  ;;  %v4083_v14 = vor.u32 %v5069_v2, %v4080_v3  ;;  %v4023_v34 = vor.u32 %v5058_v26, %v4022_v24  ;;  %v3479_v44 = vor.u32 %v4922_v36, %v3478_v35  ;;  %v4906_v60 = vld [vmem:[#allocation5 + $0x12c] sm:$0xf0] }
  0xa8   :  { %v3280_v6 = vld [vmem:[#allocation5 + $0x28] sm:$0xf0]  ;;  %v3670_v61 = vld [vmem:[#allocation5 + $0x310] sm:$0xf] }
  0xa9   :  { %1861 = vmatpush.bf16.msrb.mxu3 %v4179_v38  ;;  %1836 = vmatpush.bf16.msrb.mxu1 %v3635_v45  ;;  %v4933_v11 = vld [vmem:[#allocation5 + $0x20c] sm:$0xf]  ;;  %v3283_v22 = vor.u32 %v4869_v5, %v3280_v6  ;;  %v4279_v38 = vor.u32 %v5122_v30, %v4278_v29  ;;  %v3735_v45 = vor.u32 %v4986_v39, %v3734_v37  ;;  %v4970_v63 = vld [vmem:[#allocation5 + $0x32c] sm:$0xf0] }
  0xaa   :  { %v3536_v12 = vld [vmem:[#allocation5 + $0x228] sm:$0xf0]  ;;  %v3926_v0 = vld [vmem:[#allocation5 + $0x510] sm:$0xf]  ;;  %v3671_v5 = vor.u32 %v4970_v63, %v3670_v61  ;;  %v5054_v61 = vld [vmem:[#allocation5 + $0x5d4] sm:$0xf] }
  0xab   :  { %1849 = vmatpush.bf16.msrb.mxu2 %v3891_v46  ;;  %1824 = vmatpush.bf16.msrb.mxu0 %v3347_v56  ;;  %v4997_v13 = vld [vmem:[#allocation5 + $0x40c] sm:$0xf]  ;;  %v3539_v27 = vor.u32 %v4933_v11, %v3536_v12  ;;  %v3991_v46 = vor.u32 %v5050_v41, %v3990_v40  ;;  %v3447_v56 = vor.u32 %v4914_v48, %v3446_v47  ;;  %v5034_v1 = vld [vmem:[#allocation5 + $0x52c] sm:$0xf0] }
  0xac   :  { %v3792_v16 = vld [vmem:[#allocation5 + $0x428] sm:$0xf0]  ;;  %v4182_v2 = vld [vmem:[#allocation5 + $0x710] sm:$0xf]  ;;  %v3927_v6 = vor.u32 %v5034_v1, %v3926_v0  ;;  %v5118_v1 = vld [vmem:[#allocation5 + $0x7d4] sm:$0xf] }
  0xad   :  { %1862 = vmatpush.bf16.msrb.mxu3 %v4147_v50  ;;  %1837 = vmatpush.bf16.msrb.mxu1 %v3603_v57  ;;  %v5061_v17 = vld [vmem:[#allocation5 + $0x60c] sm:$0xf]  ;;  %v3795_v28 = vor.u32 %v4997_v13, %v3792_v16  ;;  %v4247_v50 = vor.u32 %v5114_v43, %v4246_v42  ;;  %v3703_v57 = vor.u32 %v4978_v51, %v3702_v49  ;;  %v5098_v3 = vld [vmem:[#allocation5 + $0x72c] sm:$0xf0] }
  0xae   :  { %v4048_v18 = vld [vmem:[#allocation5 + $0x628] sm:$0xf0]  ;;  %v3638_v11 = vld [vmem:[#allocation5 + $0x2d0] sm:$0xf]  ;;  %v4183_v12 = vor.u32 %v5098_v3, %v4182_v2  ;;  %v4280_v2 = vld [vmem:[#allocation5 + $0x7f0] sm:$0xf0] }
  0xaf   :  { %1850 = vmatpush.bf16.msrb.mxu2 %v3859_v58  ;;  %1825 = vmatpush.bf16.msrb.mxu0 %v3315_v4  ;;  %v4051_v31 = vor.u32 %v5061_v17, %v4048_v18  ;;  %v3959_v58 = vor.u32 %v5042_v53, %v3958_v52  ;;  %v3415_v4 = vor.u32 %v4906_v60, %v3414_v59  ;;  %v4962_v13 = vld [vmem:[#allocation5 + $0x2ec] sm:$0xf0]  ;;  %v3768_v60 = vld [vmem:[#allocation5 + $0x3f0] sm:$0xf0] }
  0xb0   :  { %v5026_v16 = vld [vmem:[#allocation5 + $0x4ec] sm:$0xf0]  ;;  %v3639_v20 = vor.u32 %v4962_v13, %v3638_v11  ;;  %v4982_v11 = vld [vmem:[#allocation5 + $0x394] sm:$0xf] }
  0xb1   :  { %1863 = vmatpush.bf16.msrb.mxu3 %v4115_v62  ;;  %1838 = vmatpush.bf16.msrb.mxu1 %v3571_v7  ;;  %v4215_v62 = vor.u32 %v5106_v55, %v4214_v54  ;;  %v3382_v7 = vld [vmem:[#allocation5 + $0xd0] sm:$0xf]  ;;  %v3736_v13 = vld [vmem:[#allocation5 + $0x3b0] sm:$0xf0] }
  0xb2   :  { %v4150_v17 = vld [vmem:[#allocation5 + $0x6d0] sm:$0xf] }
  0xb3   :  { %1851 = vmatpush.bf16.msrb.mxu2 %v3827_v10  ;;  %1826 = vmatpush.bf16.msrb.mxu0 %v3283_v22  ;;  %v4898_v10 = vld [vmem:[#allocation5 + $0xec] sm:$0xf0] }
  0xb4   :  { %v5090_v18 = vld [vmem:[#allocation5 + $0x6ec] sm:$0xf0]  ;;  %v3383_v19 = vor.u32 %v4898_v10, %v3382_v7  ;;  %v4918_v7 = vld [vmem:[#allocation5 + $0x194] sm:$0xf] }
  0xb5   :  { %1864 = vmatpush.bf16.msrb.mxu3 %v4083_v14  ;;  %1839 = vmatpush.bf16.msrb.mxu1 %v3539_v27  ;;  %v3894_v14 = vld [vmem:[#allocation5 + $0x4d0] sm:$0xf]  ;;  %v4151_v26 = vor.u32 %v5090_v18, %v4150_v17  ;;  %v3480_v10 = vld [vmem:[#allocation5 + $0x1b0] sm:$0xf0] }
  0xb6   :  { %1827 = vmatmul.bf16.vlgmr.msrb.gmra.mxu0 %v5507_v9  ;;  %v3895_v21 = vor.u32 %v5026_v16, %v3894_v14  ;;  %v3350_v22 = vld [vmem:[#allocation5 + $0x90] sm:$0xf]  ;;  %v5046_v14 = vld [vmem:[#allocation5 + $0x594] sm:$0xf] }
  0xb7   :  { %1852 = vmatpush.bf16.msrb.mxu2 %v3795_v28  ;;  %1871 = vmatpush.bf16.msra.mxu0 %v3511_v32  ;;  %v4890_v23 = vld [vmem:[#allocation5 + $0xac] sm:$0xf0]  ;;  %v3992_v16 = vld [vmem:[#allocation5 + $0x5b0] sm:$0xf0] }
  0xb8   :  { %1840 = vmatmul.bf16.vlgmr.msrb.gmra.mxu1 %v5514_v25  ;;  %v3606_v24 = vld [vmem:[#allocation5 + $0x290] sm:$0xf]  ;;  %v3351_v32 = vor.u32 %v4890_v23, %v3350_v22  ;;  %v5110_v17 = vld [vmem:[#allocation5 + $0x794] sm:$0xf] }
  0xb9   :  { %1865 = vmatpush.bf16.msrb.mxu3 %v4051_v31  ;;  %1884 = vmatpush.bf16.msra.mxu1 %v3767_v33  ;;  %v4954_v27 = vld [vmem:[#allocation5 + $0x2ac] sm:$0xf0]  ;;  %v4248_v18 = vld [vmem:[#allocation5 + $0x7b0] sm:$0xf0] }
  0xba   :  { %1853 = vmatmul.bf16.vlgmr.msrb.gmra.mxu2 %v5505_v8  ;;  %v3862_v28 = vld [vmem:[#allocation5 + $0x490] sm:$0xf]  ;;  %v3607_v33 = vor.u32 %v4954_v27, %v3606_v24  ;;  %v4910_v22 = vld [vmem:[#allocation5 + $0x154] sm:$0xf] }
  0xbb   :  { %1897 = vmatpush.bf16.msra.mxu2 %v4023_v34  ;;  %1872 = vmatpush.bf16.msra.mxu0 %v3479_v44  ;;  %v5018_v29 = vld [vmem:[#allocation5 + $0x4ac] sm:$0xf0]  ;;  %v3448_v23 = vld [vmem:[#allocation5 + $0x170] sm:$0xf0] }
  0xbc   :  { %1866 = vmatmul.bf16.vlgmr.msrb.gmra.mxu3 %v5509_v15  ;;  %v4118_v30 = vld [vmem:[#allocation5 + $0x690] sm:$0xf]  ;;  %v3863_v34 = vor.u32 %v5018_v29, %v3862_v28  ;;  %v4974_v24 = vld [vmem:[#allocation5 + $0x354] sm:$0xf] }
  0xbd   :  { %1910 = vmatpush.bf16.msra.mxu3 %v4279_v38  ;;  %1885 = vmatpush.bf16.msra.mxu1 %v3735_v45  ;;  %v5082_v31 = vld [vmem:[#allocation5 + $0x6ac] sm:$0xf0]  ;;  %v3704_v27 = vld [vmem:[#allocation5 + $0x370] sm:$0xf0] }
  0xbe   :  { %v3318_v35 = vld [vmem:[#allocation5 + $0x50] sm:$0xf]  ;;  %v4119_v38 = vor.u32 %v5082_v31, %v4118_v30  ;;  %v5038_v28 = vld [vmem:[#allocation5 + $0x554] sm:$0xf] }
  0xbf   :  { %1898 = vmatpush.bf16.msra.mxu2 %v3991_v46  ;;  %1873 = vmatpush.bf16.msra.mxu0 %v3447_v56  ;;  %v4882_v36 = vld [vmem:[#allocation5 + $0x6c] sm:$0xf0]  ;;  %v4926_v56 = vld [vmem:[#allocation5 + $0x1d4] sm:$0xf] }
  0xc0   :  { %v3574_v37 = vld [vmem:[#allocation5 + $0x250] sm:$0xf]  ;;  %v3319_v44 = vor.u32 %v4882_v36, %v3318_v35  ;;  %v3960_v29 = vld [vmem:[#allocation5 + $0x570] sm:$0xf0] }
  0xc1   :  { %1911 = vmatpush.bf16.msra.mxu3 %v4247_v50  ;;  %1886 = vmatpush.bf16.msra.mxu1 %v3703_v57  ;;  %v4946_v39 = vld [vmem:[#allocation5 + $0x26c] sm:$0xf0]  ;;  %v3512_v57 = vld [vmem:[#allocation5 + $0x1f0] sm:$0xf0]  ;;  %v3963_v35 = vor.u32 %v5038_v28, %v3960_v29 }
  0xc2   :  { %v3830_v40 = vld [vmem:[#allocation5 + $0x450] sm:$0xf]  ;;  %v3575_v47 = vor.u32 %v4946_v39, %v3574_v37  ;;  %v5102_v30 = vld [vmem:[#allocation5 + $0x754] sm:$0xf] }
  0xc3   :  { %1899 = vmatpush.bf16.msra.mxu2 %v3959_v58  ;;  %1874 = vmatpush.bf16.msra.mxu0 %v3415_v4  ;;  %v5010_v41 = vld [vmem:[#allocation5 + $0x46c] sm:$0xf0]  ;;  %v4990_v58 = vld [vmem:[#allocation5 + $0x3d4] sm:$0xf]  ;;  %v3515_v4 = vor.u32 %v4926_v56, %v3512_v57 }
  0xc4   :  { %v4086_v42 = vld [vmem:[#allocation5 + $0x650] sm:$0xf]  ;;  %v3831_v48 = vor.u32 %v5010_v41, %v3830_v40  ;;  %v4216_v31 = vld [vmem:[#allocation5 + $0x770] sm:$0xf0] }
  0xc5   :  { %1912 = vmatpush.bf16.msra.mxu3 %v4215_v62  ;;  %1887 = vmatpush.bf16.msra.mxu1 %v3671_v5  ;;  %v5074_v43 = vld [vmem:[#allocation5 + $0x66c] sm:$0xf0]  ;;  %v4024_v62 = vld [vmem:[#allocation5 + $0x5f0] sm:$0xf0]  ;;  %v3771_v5 = vor.u32 %v4990_v58, %v3768_v60  ;;  %v4219_v39 = vor.u32 %v5102_v30, %v4216_v31 }
  0xc6   :  { %v3286_v45 = vld [vmem:[#allocation5 + $0x10] sm:$0xf]  ;;  %v4087_v52 = vor.u32 %v5074_v43, %v4086_v42  ;;  %v3416_v36 = vld [vmem:[#allocation5 + $0x130] sm:$0xf0]  ;;  %v5533_v42 = vld [vmem:[#allocation7] sm:$0xff] }
  0xc7   :  { %1900 = vmatpush.bf16.msra.mxu2 %v3927_v6  ;;  %1875 = vmatpush.bf16.msra.mxu0 %v3383_v19  ;;  %v4874_v46 = vld [vmem:[#allocation5 + $0x2c] sm:$0xf0]  ;;  %v4027_v6 = vor.u32 %v5054_v61, %v4024_v62  ;;  %v3483_v19 = vor.u32 %v4918_v7, %v3480_v10  ;;  %v4966_v37 = vld [vmem:[#allocation5 + $0x314] sm:$0xf] }
  0xc8   :  { %v3542_v49 = vld [vmem:[#allocation5 + $0x210] sm:$0xf]  ;;  %v3287_v59 = vor.u32 %v4874_v46, %v3286_v45  ;;  %v5030_v40 = vld [vmem:[#allocation5 + $0x514] sm:$0xf] }
  0xc9   :  { %1913 = vmatpush.bf16.msra.mxu3 %v4183_v12  ;;  %1888 = vmatpush.bf16.msra.mxu1 %v3639_v20  ;;  %v4938_v50 = vld [vmem:[#allocation5 + $0x22c] sm:$0xf0]  ;;  %v4283_v12 = vor.u32 %v5118_v1, %v4280_v2  ;;  %v3739_v20 = vor.u32 %v4982_v11, %v3736_v13  ;;  %v3928_v41 = vld [vmem:[#allocation5 + $0x530] sm:$0xf0] }
  0xca   :  { %v3798_v51 = vld [vmem:[#allocation5 + $0x410] sm:$0xf]  ;;  %v3543_v63 = vor.u32 %v4938_v50, %v3542_v49  ;;  %v5094_v43 = vld [vmem:[#allocation5 + $0x714] sm:$0xf] }
  0xcb   :  { %1901 = vmatpush.bf16.msra.mxu2 %v3895_v21  ;;  %1876 = vmatpush.bf16.msra.mxu0 %v3351_v32  ;;  %v5002_v53 = vld [vmem:[#allocation5 + $0x42c] sm:$0xf0]  ;;  %v3995_v21 = vor.u32 %v5046_v14, %v3992_v16  ;;  %v3451_v32 = vor.u32 %v4910_v22, %v3448_v23  ;;  %v4894_v46 = vld [vmem:[#allocation5 + $0xd4] sm:$0xf] }
  0xcc   :  { %v4054_v54 = vld [vmem:[#allocation5 + $0x610] sm:$0xf]  ;;  %v3799_v0 = vor.u32 %v5002_v53, %v3798_v51  ;;  %v3384_v49 = vld [vmem:[#allocation5 + $0xf0] sm:$0xf0]  ;;  %v367_v51 = vperm.slane %v5533_v42, 0 }
  0xcd   :  { %1914 = vmatpush.bf16.msra.mxu3 %v4151_v26  ;;  %1889 = vmatpush.bf16.msra.mxu1 %v3607_v33  ;;  %v5066_v55 = vld [vmem:[#allocation5 + $0x62c] sm:$0xf0]  ;;  %v4251_v26 = vor.u32 %v5110_v17, %v4248_v18  ;;  %v4902_v33 = vld [vmem:[#allocation5 + $0x114] sm:$0xf]  ;;  %v3387_v58 = vor.u32 %v4894_v46, %v3384_v49  ;;  %v3774_v46 = vld [vmem:[#allocation5 + $0x3d8] sm:$0xf] }
  0xce   :  { %v4055_v3 = vor.u32 %v5066_v55, %v4054_v54  ;;  %v3419_v45 = vor.u32 %v4902_v33, %v3416_v36  ;;  %v4958_v50 = vld [vmem:[#allocation5 + $0x2d4] sm:$0xf]  ;;  %v4030_v49 = vld [vmem:[#allocation5 + $0x5d8] sm:$0xf] }
  0xcf   :  { %1902 = vmatpush.bf16.msra.mxu2 %v3863_v34  ;;  %1877 = vmatpush.bf16.msra.mxu0 %v3319_v44  ;;  %v3707_v34 = vor.u32 %v4974_v24, %v3704_v27  ;;  %v4184_v44 = vld [vmem:[#allocation5 + $0x730] sm:$0xf0] }
  0xd0   :  { %v3640_v53 = vld [vmem:[#allocation5 + $0x2f0] sm:$0xf0] }
  0xd1   :  { %1915 = vmatpush.bf16.msra.mxu3 %v4119_v38  ;;  %1890 = vmatpush.bf16.msra.mxu1 %v3575_v47  ;;  %v3672_v38 = vld [vmem:[#allocation5 + $0x330] sm:$0xf0]  ;;  %v3643_v60 = vor.u32 %v4958_v50, %v3640_v53  ;;  %v5059_v50 = vld [vmem:[#allocation5 + $0x5f4] sm:$0xf0] }
  0xd2   :  { %v3675_v47 = vor.u32 %v4966_v37, %v3672_v38  ;;  %v5022_v54 = vld [vmem:[#allocation5 + $0x4d4] sm:$0xf] }
  0xd3   :  { %1903 = vmatpush.bf16.msra.mxu2 %v3831_v48  ;;  %1878 = vmatpush.bf16.msra.mxu0 %v3287_v59  ;;  %v3931_v48 = vor.u32 %v5030_v40, %v3928_v41  ;;  %v3896_v55 = vld [vmem:[#allocation5 + $0x4f0] sm:$0xf0] }
  0xd4   :  { %v5086_v56 = vld [vmem:[#allocation5 + $0x6d4] sm:$0xf]  ;;  %v3899_v61 = vor.u32 %v5022_v54, %v3896_v55  ;;  %v4286_v54 = vld [vmem:[#allocation5 + $0x7d8] sm:$0xf] }
  0xd5   :  { %1916 = vmatpush.bf16.msra.mxu3 %v4087_v52  ;;  %1891 = vmatpush.bf16.msra.mxu1 %v3543_v63  ;;  %v4187_v52 = vor.u32 %v5094_v43, %v4184_v44  ;;  %v4152_v57 = vld [vmem:[#allocation5 + $0x6f0] sm:$0xf0]  ;;  %v1685_v11 = vpop.f32.mrf.mxu1  ;;  %v3518_v44 = vld [vmem:[#allocation5 + $0x1d8] sm:$0xf] }
  0xd6   :  { %1879 = vmatmul.bf16.vlgmr.msra.gmra.mxu0 %v5507_v9  ;;  %v4886_v62 = vld [vmem:[#allocation5 + $0x94] sm:$0xf]  ;;  %v4155_v2 = vor.u32 %v5086_v56, %v4152_v57  ;;  %v5123_v55 = vld [vmem:[#allocation5 + $0x7f4] sm:$0xf0] }
  0xd7   :  { %1904 = vmatpush.bf16.msra.mxu2 %v3799_v0  ;;  %1923 = vmatpush.bf16.msrb.mxu0 %v3515_v4  ;;  %v1672_v59 = vpop.f32.mrf.mxu0  ;;  %v3352_v63 = vld [vmem:[#allocation5 + $0xb0] sm:$0xf0] }
  0xd8   :  { %1892 = vmatmul.bf16.vlgmr.msra.gmra.mxu1 %v5514_v25  ;;  %v4950_v0 = vld [vmem:[#allocation5 + $0x294] sm:$0xf]  ;;  %v1673_v1 = vadd.f32 %v1672_v59, %v367_v51  ;;  %v3355_v10 = vor.u32 %v4886_v62, %v3352_v63  ;;  %v4923_v62 = vld [vmem:[#allocation5 + $0x1b4] sm:$0xf0] }
  0xd9   :  { %1917 = vmatpush.bf16.msra.mxu3 %v4055_v3  ;;  %1936 = vmatpush.bf16.msrb.mxu1 %v3771_v5  ;;  %v3608_v3 = vld [vmem:[#allocation5 + $0x2b0] sm:$0xf0]  ;;  %v3742_v63 = vld [vmem:[#allocation5 + $0x398] sm:$0xf] }
  0xda   :  { %1905 = vmatmul.bf16.vlgmr.msra.gmra.mxu2 %v5505_v8  ;;  %v5014_v4 = vld [vmem:[#allocation5 + $0x494] sm:$0xf]  ;;  %v1686_v18 = vadd.f32 %v1685_v11, %v1673_v1  ;;  %v4287_v1 = vor.u32 %v5123_v55, %v4286_v54 }
  0xdb   :  { %1949 = vmatpush.bf16.msrb.mxu2 %v4027_v6  ;;  %1924 = vmatpush.bf16.msrb.mxu0 %v3483_v19  ;;  %v3864_v5 = vld [vmem:[#allocation5 + $0x4b0] sm:$0xf0] }
  0xdc   :  { %1918 = vmatmul.bf16.vlgmr.msra.gmra.mxu3 %v5509_v15  ;;  %v5078_v6 = vld [vmem:[#allocation5 + $0x694] sm:$0xf]  ;;  %v3867_v13 = vor.u32 %v5014_v4, %v3864_v5  ;;  %v5051_v4 = vld [vmem:[#allocation5 + $0x5b4] sm:$0xf0] }
  0xdd   :  { %1962 = vmatpush.bf16.msrb.mxu3 %v4283_v12  ;;  %1937 = vmatpush.bf16.msrb.mxu1 %v3739_v20  ;;  %v4120_v7 = vld [vmem:[#allocation5 + $0x6b0] sm:$0xf0]  ;;  %v3611_v12 = vor.u32 %v4950_v0, %v3608_v3  ;;  %v1698_v23 = vpop.f32.mrf.mxu2  ;;  %v1687_v51 = vpop.f32.mrf.mxu1  ;;  %v3998_v3 = vld [vmem:[#allocation5 + $0x598] sm:$0xf] }
  0xde   :  { %v4878_v14 = vld [vmem:[#allocation5 + $0x54] sm:$0xf]  ;;  %v4123_v19 = vor.u32 %v5078_v6, %v4120_v7  ;;  %v1699_v27 = vadd.f32 %v1698_v23, %v1686_v18  ;;  %v4254_v5 = vld [vmem:[#allocation5 + $0x798] sm:$0xf]  ;;  %v3999_v11 = vor.u32 %v5051_v4, %v3998_v3 }
  0xdf   :  { %1950 = vmatpush.bf16.msrb.mxu2 %v3995_v21  ;;  %1925 = vmatpush.bf16.msrb.mxu0 %v3451_v32  ;;  %v3320_v16 = vld [vmem:[#allocation5 + $0x70] sm:$0xf0]  ;;  %v1711_v28 = vpop.f32.mrf.mxu3  ;;  %v1674_v32 = vpop.f32.mrf.mxu0  ;;  %v5115_v6 = vld [vmem:[#allocation5 + $0x7b4] sm:$0xf0] }
  0xe0   :  { %v4942_v17 = vld [vmem:[#allocation5 + $0x254] sm:$0xf]  ;;  %v3323_v29 = vor.u32 %v4878_v14, %v3320_v16  ;;  %v5536_v38 = vadd.f32 %v1711_v28, %v1699_v27  ;;  %v3710_v14 = vld [vmem:[#allocation5 + $0x358] sm:$0xf]  ;;  %v4255_v16 = vor.u32 %v5115_v6, %v4254_v5 }
  0xe1   :  { %1963 = vmatpush.bf16.msrb.mxu3 %v4251_v26  ;;  %1938 = vmatpush.bf16.msrb.mxu1 %v3707_v34  ;;  %v3576_v20 = vld [vmem:[#allocation5 + $0x270] sm:$0xf0]  ;;  %v3966_v18 = vld [vmem:[#allocation5 + $0x558] sm:$0xf] }
  0xe2   :  { %v5006_v21 = vld [vmem:[#allocation5 + $0x454] sm:$0xf]  ;;  %v3579_v33 = vor.u32 %v4942_v17, %v3576_v20  ;;  %v4979_v17 = vld [vmem:[#allocation5 + $0x374] sm:$0xf0] }
  0xe3   :  { %1951 = vmatpush.bf16.msrb.mxu2 %v3963_v35  ;;  %1926 = vmatpush.bf16.msrb.mxu0 %v3419_v45  ;;  %v3832_v22 = vld [vmem:[#allocation5 + $0x470] sm:$0xf0]  ;;  %v4931_v45 = vld [vmem:[#allocation5 + $0x1f4] sm:$0xf0] }
  0xe4   :  { %v5070_v24 = vld [vmem:[#allocation5 + $0x654] sm:$0xf]  ;;  %v3835_v34 = vor.u32 %v5006_v21, %v3832_v22  ;;  %v3519_v57 = vor.u32 %v4931_v45, %v3518_v44  ;;  %v4222_v20 = vld [vmem:[#allocation5 + $0x758] sm:$0xf] }
  0xe5   :  { %1964 = vmatpush.bf16.msrb.mxu3 %v4219_v39  ;;  %1939 = vmatpush.bf16.msrb.mxu1 %v3675_v47  ;;  %v4088_v26 = vld [vmem:[#allocation5 + $0x670] sm:$0xf0]  ;;  %v5107_v21 = vld [vmem:[#allocation5 + $0x774] sm:$0xf0] }
  0xe6   :  { %v4870_v30 = vld [vmem:[#allocation5 + $0x14] sm:$0xf]  ;;  %v4091_v39 = vor.u32 %v5070_v24, %v4088_v26  ;;  %v3422_v23 = vld [vmem:[#allocation5 + $0x118] sm:$0xf]  ;;  %v3711_v24 = vor.u32 %v4979_v17, %v3710_v14 }
  0xe7   :  { %1952 = vmatpush.bf16.msrb.mxu2 %v3931_v48  ;;  %1927 = vmatpush.bf16.msrb.mxu0 %v3387_v58  ;;  %v3288_v31 = vld [vmem:[#allocation5 + $0x30] sm:$0xf0]  ;;  %v4995_v48 = vld [vmem:[#allocation5 + $0x3f4] sm:$0xf0]  ;;  %v1700_v58 = vpop.f32.mrf.mxu2  ;;  %v1713_v0 = vpop.f32.mrf.mxu3 }
  0xe8   :  { %v4934_v35 = vld [vmem:[#allocation5 + $0x214] sm:$0xf]  ;;  %v3291_v47 = vor.u32 %v4870_v30, %v3288_v31  ;;  %v3775_v59 = vor.u32 %v4995_v48, %v3774_v46  ;;  %v4907_v27 = vld [vmem:[#allocation5 + $0x134] sm:$0xf0]  ;;  %v4223_v30 = vor.u32 %v5107_v21, %v4222_v20 }
  0xe9   :  { %1965 = vmatpush.bf16.msrb.mxu3 %v4187_v52  ;;  %1940 = vmatpush.bf16.msrb.mxu1 %v3643_v60  ;;  %v3544_v36 = vld [vmem:[#allocation5 + $0x230] sm:$0xf0]  ;;  %v4031_v60 = vor.u32 %v5059_v50, %v4030_v49  ;;  %v3678_v28 = vld [vmem:[#allocation5 + $0x318] sm:$0xf] }
  0xea   :  { %v4998_v37 = vld [vmem:[#allocation5 + $0x414] sm:$0xf]  ;;  %v3547_v52 = vor.u32 %v4934_v35, %v3544_v36  ;;  %v4971_v31 = vld [vmem:[#allocation5 + $0x334] sm:$0xf0]  ;;  %v3423_v36 = vor.u32 %v4907_v27, %v3422_v23 }
  0xeb   :  { %1953 = vmatpush.bf16.msrb.mxu2 %v3899_v61  ;;  %1928 = vmatpush.bf16.msrb.mxu0 %v3355_v10  ;;  %v3800_v40 = vld [vmem:[#allocation5 + $0x430] sm:$0xf0]  ;;  %v3486_v61 = vld [vmem:[#allocation5 + $0x198] sm:$0xf] }
  0xec   :  { %v5062_v41 = vld [vmem:[#allocation5 + $0x614] sm:$0xf]  ;;  %v3803_v53 = vor.u32 %v4998_v37, %v3800_v40  ;;  %v3487_v7 = vor.u32 %v4923_v62, %v3486_v61  ;;  %v3934_v32 = vld [vmem:[#allocation5 + $0x518] sm:$0xf] }
  0xed   :  { %1966 = vmatpush.bf16.msrb.mxu3 %v4155_v2  ;;  %1941 = vmatpush.bf16.msrb.mxu1 %v3611_v12  ;;  %v4056_v43 = vld [vmem:[#allocation5 + $0x630] sm:$0xf0]  ;;  %v4987_v2 = vld [vmem:[#allocation5 + $0x3b4] sm:$0xf0] }
  0xee   :  { %v4059_v56 = vor.u32 %v5062_v41, %v4056_v43  ;;  %v3743_v10 = vor.u32 %v4987_v2, %v3742_v63  ;;  %v3454_v12 = vld [vmem:[#allocation5 + $0x158] sm:$0xf] }
  0xef   :  { %1954 = vmatpush.bf16.msrb.mxu2 %v3867_v13  ;;  %1929 = vmatpush.bf16.msrb.mxu0 %v3323_v29  ;;  %v4915_v13 = vld [vmem:[#allocation5 + $0x174] sm:$0xf0]  ;;  %v368_v29 = vperm.slane %v5533_v42, 1 }
  0xf0   :  { %v3455_v22 = vor.u32 %v4915_v13, %v3454_v12  ;;  %v5099_v35 = vld [vmem:[#allocation5 + $0x734] sm:$0xf0] }
  0xf1   :  { %1967 = vmatpush.bf16.msrb.mxu3 %v4123_v19  ;;  %1942 = vmatpush.bf16.msrb.mxu1 %v3579_v33  ;;  %v5043_v19 = vld [vmem:[#allocation5 + $0x574] sm:$0xf0] }
  0xf2   :  { %v3967_v26 = vor.u32 %v5043_v19, %v3966_v18  ;;  %v5035_v33 = vld [vmem:[#allocation5 + $0x534] sm:$0xf0] }
  0xf3   :  { %1955 = vmatpush.bf16.msrb.mxu2 %v3835_v34  ;;  %1930 = vmatpush.bf16.msrb.mxu0 %v3291_v47  ;;  %v4190_v34 = vld [vmem:[#allocation5 + $0x718] sm:$0xf]  ;;  %v1724_v37 = vpop.f32.mrf.mxu0  ;;  %v3935_v40 = vor.u32 %v5035_v33, %v3934_v32 }
  0xf4   :  { %v3390_v41 = vld [vmem:[#allocation5 + $0xd8] sm:$0xf]  ;;  %v1725_v45 = vadd.f32 %v1724_v37, %v368_v29  ;;  %v4191_v47 = vor.u32 %v5099_v35, %v4190_v34 }
  0xf5   :  { %1968 = vmatpush.bf16.msrb.mxu3 %v4091_v39  ;;  %1943 = vmatpush.bf16.msrb.mxu1 %v3547_v52  ;;  %v3679_v39 = vor.u32 %v4971_v31, %v3678_v28  ;;  %v4899_v43 = vld [vmem:[#allocation5 + $0xf4] sm:$0xf0]  ;;  %v1737_v46 = vpop.f32.mrf.mxu1 }
  0xf6   :  { %1931 = vmatmul.bf16.vlgmr.msrb.gmra.mxu0 %v5507_v9  ;;  %v3646_v44 = vld [vmem:[#allocation5 + $0x2d8] sm:$0xf]  ;;  %v3391_v54 = vor.u32 %v4899_v43, %v3390_v41  ;;  %v4991_v41 = vld [vmem:[#allocation5 + $0x3dc] sm:$0xf] }
  0xf7   :  { %1956 = vmatpush.bf16.msrb.mxu2 %v3803_v53  ;;  %1975 = vmatpush.bf16.msra.mxu0 %v3519_v57  ;;  %v4963_v48 = vld [vmem:[#allocation5 + $0x2f4] sm:$0xf0]  ;;  %v1738_v53 = vadd.f32 %v1737_v46, %v1725_v45  ;;  %v5055_v45 = vld [vmem:[#allocation5 + $0x5dc] sm:$0xf] }
  0xf8   :  { %1944 = vmatmul.bf16.vlgmr.msrb.gmra.mxu1 %v5514_v25  ;;  %v3902_v49 = vld [vmem:[#allocation5 + $0x4d8] sm:$0xf]  ;;  %v3647_v55 = vor.u32 %v4963_v48, %v3646_v44  ;;  %v3776_v44 = vld [vmem:[#allocation5 + $0x3f8] sm:$0xf0] }
  0xf9   :  { %1969 = vmatpush.bf16.msrb.mxu3 %v4059_v56  ;;  %1988 = vmatpush.bf16.msra.mxu1 %v3775_v59  ;;  %v5027_v50 = vld [vmem:[#allocation5 + $0x4f4] sm:$0xf0]  ;;  %v4032_v46 = vld [vmem:[#allocation5 + $0x5f8] sm:$0xf0] }
  0xfa   :  { %1957 = vmatmul.bf16.vlgmr.msrb.gmra.mxu2 %v5505_v8  ;;  %v4158_v51 = vld [vmem:[#allocation5 + $0x6d8] sm:$0xf]  ;;  %v3903_v56 = vor.u32 %v5027_v50, %v3902_v49  ;;  %v5119_v49 = vld [vmem:[#allocation5 + $0x7dc] sm:$0xf] }
  0xfb   :  { %2001 = vmatpush.bf16.msra.mxu2 %v4031_v60  ;;  %1976 = vmatpush.bf16.msra.mxu0 %v3487_v7  ;;  %v5091_v52 = vld [vmem:[#allocation5 + $0x6f4] sm:$0xf0]  ;;  %v1726_v7 = vpop.f32.mrf.mxu0  ;;  %v4288_v50 = vld [vmem:[#allocation5 + $0x7f8] sm:$0xf0] }
  0xfc   :  { %1970 = vmatmul.bf16.vlgmr.msrb.gmra.mxu3 %v5509_v15  ;;  %v3358_v57 = vld [vmem:[#allocation5 + $0x98] sm:$0xf]  ;;  %v4159_v61 = vor.u32 %v5091_v52, %v4158_v51 }
  0xfd   :  { %2014 = vmatpush.bf16.msra.mxu3 %v4287_v1  ;;  %1989 = vmatpush.bf16.msra.mxu1 %v3743_v10  ;;  %v4891_v58 = vld [vmem:[#allocation5 + $0xb4] sm:$0xf0]  ;;  %v1750_v60 = vpop.f32.mrf.mxu2 }
  0xfe   :  { %v3614_v59 = vld [vmem:[#allocation5 + $0x298] sm:$0xf]  ;;  %v1751_v1 = vadd.f32 %v1750_v60, %v1738_v53  ;;  %v3359_v5 = vor.u32 %v4891_v58, %v3358_v57  ;;  %v3779_v53 = vor.u32 %v4991_v41, %v3776_v44  ;;  %v4983_v57 = vld [vmem:[#allocation5 + $0x39c] sm:$0xf]  ;;  %v4291_v58 = vor.u32 %v5119_v49, %v4288_v50 }
  0xff   :  { %2002 = vmatpush.bf16.msra.mxu2 %v3999_v11  ;;  %1977 = vmatpush.bf16.msra.mxu0 %v3455_v22  ;;  %v4955_v62 = vld [vmem:[#allocation5 + $0x2b4] sm:$0xf0]  ;;  %v1763_v2 = vpop.f32.mrf.mxu3  ;;  %v5047_v60 = vld [vmem:[#allocation5 + $0x59c] sm:$0xf] }
 0x100   :  { %v3870_v63 = vld [vmem:[#allocation5 + $0x498] sm:$0xf]  ;;  %v5543_v6 = vadd.f32 %v1763_v2, %v1751_v1  ;;  %v3615_v10 = vor.u32 %v4955_v62, %v3614_v59  ;;  %v3744_v59 = vld [vmem:[#allocation5 + $0x3b8] sm:$0xf0] }
 0x101   :  { %2015 = vmatpush.bf16.msra.mxu3 %v4255_v16  ;;  %1990 = vmatpush.bf16.msra.mxu1 %v3711_v24  ;;  %v5019_v0 = vld [vmem:[#allocation5 + $0x4b4] sm:$0xf0]  ;;  %v1739_v16 = vpop.f32.mrf.mxu1  ;;  %v5111_v62 = vld [vmem:[#allocation5 + $0x79c] sm:$0xf]  ;;  %v3747_v1 = vor.u32 %v4983_v57, %v3744_v59 }
 0x102   :  { %v4126_v3 = vld [vmem:[#allocation5 + $0x698] sm:$0xf]  ;;  %v3871_v11 = vor.u32 %v5019_v0, %v3870_v63  ;;  %v4256_v63 = vld [vmem:[#allocation5 + $0x7b8] sm:$0xf0] }
 0x103   :  { %2003 = vmatpush.bf16.msra.mxu2 %v3967_v26  ;;  %1978 = vmatpush.bf16.msra.mxu0 %v3423_v36  ;;  %v5083_v4 = vld [vmem:[#allocation5 + $0x6b4] sm:$0xf0]  ;;  %v4259_v7 = vor.u32 %v5111_v62, %v4256_v63  ;;  %v3904_v41 = vld [vmem:[#allocation5 + $0x4f8] sm:$0xf0] }
 0x104   :  { %v3326_v12 = vld [vmem:[#allocation5 + $0x58] sm:$0xf]  ;;  %v4127_v17 = vor.u32 %v5083_v4, %v4126_v3  ;;  %v4911_v3 = vld [vmem:[#allocation5 + $0x15c] sm:$0xf] }
 0x105   :  { %2016 = vmatpush.bf16.msra.mxu3 %v4223_v30  ;;  %1991 = vmatpush.bf16.msra.mxu1 %v3679_v39  ;;  %v4883_v13 = vld [vmem:[#allocation5 + $0x74] sm:$0xf0]  ;;  %v1752_v32 = vpop.f32.mrf.mxu2  ;;  %v4927_v39 = vld [vmem:[#allocation5 + $0x1dc] sm:$0xf] }
 0x106   :  { %v3582_v14 = vld [vmem:[#allocation5 + $0x258] sm:$0xf]  ;;  %v3327_v23 = vor.u32 %v4883_v13, %v3326_v12  ;;  %v3456_v4 = vld [vmem:[#allocation5 + $0x178] sm:$0xf0] }
 0x107   :  { %2004 = vmatpush.bf16.msra.mxu2 %v3935_v40  ;;  %1979 = vmatpush.bf16.msra.mxu0 %v3391_v54  ;;  %v4947_v18 = vld [vmem:[#allocation5 + $0x274] sm:$0xf0]  ;;  %v1765_v37 = vpop.f32.mrf.mxu3  ;;  %v3520_v40 = vld [vmem:[#allocation5 + $0x1f8] sm:$0xf0]  ;;  %v4035_v54 = vor.u32 %v5055_v45, %v4032_v46  ;;  %v3459_v16 = vor.u32 %v4911_v3, %v3456_v4 }
 0x108   :  { %v3838_v19 = vld [vmem:[#allocation5 + $0x458] sm:$0xf]  ;;  %v3583_v27 = vor.u32 %v4947_v18, %v3582_v14  ;;  %v3523_v52 = vor.u32 %v4927_v39, %v3520_v40  ;;  %v3968_v12 = vld [vmem:[#allocation5 + $0x578] sm:$0xf0] }
 0x109   :  { %2017 = vmatpush.bf16.msra.mxu3 %v4191_v47  ;;  %1992 = vmatpush.bf16.msra.mxu1 %v3647_v55  ;;  %v5011_v20 = vld [vmem:[#allocation5 + $0x474] sm:$0xf0]  ;;  %v4919_v55 = vld [vmem:[#allocation5 + $0x19c] sm:$0xf] }
 0x10a   :  { %v4094_v21 = vld [vmem:[#allocation5 + $0x658] sm:$0xf]  ;;  %v3839_v28 = vor.u32 %v5011_v20, %v3838_v19  ;;  %v5103_v13 = vld [vmem:[#allocation5 + $0x75c] sm:$0xf] }
 0x10b   :  { %2005 = vmatpush.bf16.msra.mxu2 %v3903_v56  ;;  %v5075_v22 = vld [vmem:[#allocation5 + $0x674] sm:$0xf0]  ;;  %1980 = vmatpush.bf16.msra.mxu0 %v3359_v5  ;;  %v3488_v56 = vld [vmem:[#allocation5 + $0x1b8] sm:$0xf0] }
 0x10c   :  { %v3294_v24 = vld [vmem:[#allocation5 + $0x18] sm:$0xf]  ;;  %v4095_v33 = vor.u32 %v5075_v22, %v4094_v21  ;;  %v3491_v0 = vor.u32 %v4919_v55, %v3488_v56  ;;  %v4975_v5 = vld [vmem:[#allocation5 + $0x35c] sm:$0xf] }
 0x10d   :  { %2018 = vmatpush.bf16.msra.mxu3 %v4159_v61  ;;  %v4875_v26 = vld [vmem:[#allocation5 + $0x34] sm:$0xf0]  ;;  %1993 = vmatpush.bf16.msra.mxu1 %v3615_v10  ;;  %v4000_v61 = vld [vmem:[#allocation5 + $0x5b8] sm:$0xf0] }
 0x10e   :  { %v3550_v29 = vld [vmem:[#allocation5 + $0x218] sm:$0xf]  ;;  %v3295_v43 = vor.u32 %v4875_v26, %v3294_v24  ;;  %v4003_v2 = vor.u32 %v5047_v60, %v4000_v61  ;;  %v3712_v10 = vld [vmem:[#allocation5 + $0x378] sm:$0xf0] }
 0x10f   :  { %2006 = vmatpush.bf16.msra.mxu2 %v3871_v11  ;;  %v4939_v30 = vld [vmem:[#allocation5 + $0x234] sm:$0xf0]  ;;  %1981 = vmatpush.bf16.msra.mxu0 %v3327_v23  ;;  %v5039_v11 = vld [vmem:[#allocation5 + $0x55c] sm:$0xf] }
 0x110   :  { %v3806_v31 = vld [vmem:[#allocation5 + $0x418] sm:$0xf]  ;;  %v3551_v47 = vor.u32 %v4939_v30, %v3550_v29  ;;  %v4224_v14 = vld [vmem:[#allocation5 + $0x778] sm:$0xf0]  ;;  %v3971_v18 = vor.u32 %v5039_v11, %v3968_v12 }
 0x111   :  { %2019 = vmatpush.bf16.msra.mxu3 %v4127_v17  ;;  %v5003_v34 = vld [vmem:[#allocation5 + $0x434] sm:$0xf0]  ;;  %1994 = vmatpush.bf16.msra.mxu1 %v3583_v27  ;;  %v3715_v17 = vor.u32 %v4975_v5, %v3712_v10  ;;  %v4903_v19 = vld [vmem:[#allocation5 + $0x11c] sm:$0xf]  ;;  %v4227_v22 = vor.u32 %v5103_v13, %v4224_v14 }
 0x112   :  { %v4062_v35 = vld [vmem:[#allocation5 + $0x618] sm:$0xf]  ;;  %v3807_v48 = vor.u32 %v5003_v34, %v3806_v31  ;;  %v3424_v20 = vld [vmem:[#allocation5 + $0x138] sm:$0xf0] }
 0x113   :  { %v5067_v36 = vld [vmem:[#allocation5 + $0x634] sm:$0xf0]  ;;  %2007 = vmatpush.bf16.msra.mxu2 %v3839_v28  ;;  %1982 = vmatpush.bf16.msra.mxu0 %v3295_v43  ;;  %v4967_v21 = vld [vmem:[#allocation5 + $0x31c] sm:$0xf]  ;;  %v3427_v29 = vor.u32 %v4903_v19, %v3424_v20  ;;  %v5549_v30 = vpop.f32.mrf.mxu0 }
 0x114   :  { %v4063_v51 = vor.u32 %v5067_v36, %v4062_v35  ;;  %v3680_v23 = vld [vmem:[#allocation5 + $0x338] sm:$0xf0] }
 0x115   :  { %2020 = vmatpush.bf16.msra.mxu3 %v4095_v33  ;;  %1995 = vmatpush.bf16.msra.mxu1 %v3551_v47  ;;  %v5031_v24 = vld [vmem:[#allocation5 + $0x51c] sm:$0xf]  ;;  %v3683_v31 = vor.u32 %v4967_v21, %v3680_v23  ;;  %v5551_v36 = vpop.f32.mrf.mxu1 }
 0x116   :  { %1983 = vmatmul.bf16.vlgmr.msra.gmra.mxu0 %v5507_v9  ;;  %v3936_v26 = vld [vmem:[#allocation5 + $0x538] sm:$0xf0] }
 0x117   :  { %2008 = vmatpush.bf16.msra.mxu2 %v3807_v48  ;;  %2027 = vmatpush.bf16.msrb.mxu0 %v3523_v52  ;;  %v5095_v27 = vld [vmem:[#allocation5 + $0x71c] sm:$0xf]  ;;  %v3939_v32 = vor.u32 %v5031_v24, %v3936_v26 }
 0x118   :  { %1996 = vmatmul.bf16.vlgmr.msra.gmra.mxu1 %v5514_v25  ;;  %v4192_v28 = vld [vmem:[#allocation5 + $0x738] sm:$0xf0] }
 0x119   :  { %2021 = vmatpush.bf16.msra.mxu3 %v4063_v51  ;;  %2040 = vmatpush.bf16.msrb.mxu1 %v3779_v53  ;;  %v4895_v33 = vld [vmem:[#allocation5 + $0xdc] sm:$0xf]  ;;  %v4195_v37 = vor.u32 %v5095_v27, %v4192_v28  ;;  %v4350_v28 = vld [vmem:[#allocation8 + $0x70] sm:$0xf] }
 0x11a   :  { %2009 = vmatmul.bf16.vlgmr.msra.gmra.mxu2 %v5505_v8  ;;  %v3392_v34 = vld [vmem:[#allocation5 + $0xf8] sm:$0xf0] }
 0x11b   :  { %2053 = vmatpush.bf16.msrb.mxu2 %v4035_v54  ;;  %2028 = vmatpush.bf16.msrb.mxu0 %v3491_v0  ;;  %v4959_v35 = vld [vmem:[#allocation5 + $0x2dc] sm:$0xf]  ;;  %v3395_v45 = vor.u32 %v4895_v33, %v3392_v34  ;;  %v1778_v60 = vpop.f32.mrf.mxu0  ;;  %v5155_v33 = vld [vmem:[#allocation8 + $0xf4] sm:$0xf0]  ;;  %v4478_v34 = vld [vmem:[#allocation8 + $0x170] sm:$0xf] }
 0x11c   :  { %2022 = vmatmul.bf16.vlgmr.msra.gmra.mxu3 %v5509_v15  ;;  %v3648_v39 = vld [vmem:[#allocation5 + $0x2f8] sm:$0xf0] }
 0x11d   :  { %2066 = vmatpush.bf16.msrb.mxu3 %v4291_v58  ;;  %2041 = vmatpush.bf16.msrb.mxu1 %v3747_v1  ;;  %v5023_v40 = vld [vmem:[#allocation5 + $0x4dc] sm:$0xf]  ;;  %v3651_v46 = vor.u32 %v4959_v35, %v3648_v39  ;;  %v5553_v51 = vpop.f32.mrf.mxu2  ;;  %v5171_v35 = vld [vmem:[#allocation8 + $0x174] sm:$0xf0] }
 0x11e   :  { %v5087_v43 = vld [vmem:[#allocation5 + $0x6dc] sm:$0xf]  ;;  %v3907_v47 = vor.u32 %v5023_v40, %v3904_v41 }
 0x11f   :  { %2054 = vmatpush.bf16.msrb.mxu2 %v4003_v2  ;;  %2029 = vmatpush.bf16.msrb.mxu0 %v3459_v16  ;;  %v4160_v44 = vld [vmem:[#allocation5 + $0x6f8] sm:$0xf0]  ;;  %v5555_v56 = vpop.f32.mrf.mxu3  ;;  %v1791_v2 = vpop.f32.mrf.mxu1 }
 0x120   :  { %v4887_v48 = vld [vmem:[#allocation5 + $0x9c] sm:$0xf]  ;;  %v4163_v52 = vor.u32 %v5087_v43, %v4160_v44  ;;  %v4542_v43 = vld [vmem:[#allocation8 + $0x1f0] sm:$0xf]  ;;  %v5187_v44 = vld [vmem:[#allocation8 + $0x1f4] sm:$0xf0] }
 0x121   :  { %2067 = vmatpush.bf16.msrb.mxu3 %v4259_v7  ;;  %2042 = vmatpush.bf16.msrb.mxu1 %v3715_v17  ;;  %v3360_v49 = vld [vmem:[#allocation5 + $0xb8] sm:$0xf0]  ;;  %v5167_v2 = vld [vmem:[#allocation8 + $0x154] sm:$0xf0] }
 0x122   :  { %v4951_v50 = vld [vmem:[#allocation5 + $0x29c] sm:$0xf]  ;;  %v3363_v59 = vor.u32 %v4887_v48, %v3360_v49  ;;  %v5137_v48 = vld [vmem:[#allocation8 + $0x64] sm:$0xf0]  ;;  %v4406_v49 = vld [vmem:[#allocation8 + $0xe0] sm:$0xf] }
 0x123   :  { %2055 = vmatpush.bf16.msrb.mxu2 %v3971_v18  ;;  %2030 = vmatpush.bf16.msrb.mxu0 %v3427_v29  ;;  %v3616_v53 = vld [vmem:[#allocation5 + $0x2b8] sm:$0xf0]  ;;  %v5139_v29 = vld [vmem:[#allocation8 + $0x74] sm:$0xf0] }
 0x124   :  { %v5015_v54 = vld [vmem:[#allocation5 + $0x49c] sm:$0xf]  ;;  %v3619_v61 = vor.u32 %v4951_v50, %v3616_v53  ;;  %v4351_v41 = vor.u32 %v5139_v29, %v4350_v28  ;;  %v5153_v50 = vld [vmem:[#allocation8 + $0xe4] sm:$0xf0]  ;;  %v5147_v29 = vld [vmem:[#allocation8 + $0xb4] sm:$0xf0] }
 0x125   :  { %2068 = vmatpush.bf16.msrb.mxu3 %v4227_v22  ;;  %2043 = vmatpush.bf16.msrb.mxu1 %v3683_v31  ;;  %v3872_v55 = vld [vmem:[#allocation5 + $0x4b8] sm:$0xf0]  ;;  %v1804_v21 = vpop.f32.mrf.mxu2  ;;  %v4414_v31 = vld [vmem:[#allocation8 + $0xf0] sm:$0xf]  ;;  %v5169_v53 = vld [vmem:[#allocation8 + $0x164] sm:$0xf0] }
 0x126   :  { %v5079_v57 = vld [vmem:[#allocation5 + $0x69c] sm:$0xf]  ;;  %v3875_v62 = vor.u32 %v5015_v54, %v3872_v55  ;;  %v4543_v54 = vor.u32 %v5187_v44, %v4542_v43  ;;  %v4310_v43 = vld [vmem:[#allocation8 + $0x20] sm:$0xf]  ;;  %v5129_v44 = vld [vmem:[#allocation8 + $0x24] sm:$0xf0] }
 0x127   :  { %2056 = vmatpush.bf16.msrb.mxu2 %v3939_v32  ;;  %v4128_v58 = vld [vmem:[#allocation5 + $0x6b8] sm:$0xf0]  ;;  %2031 = vmatpush.bf16.msrb.mxu0 %v3395_v45  ;;  %v1817_v27 = vpop.f32.mrf.mxu3  ;;  %v4415_v45 = vor.u32 %v5155_v33, %v4414_v31  ;;  %v4446_v31 = vld [vmem:[#allocation8 + $0x130] sm:$0xf] }
 0x128   :  { %v4879_v63 = vld [vmem:[#allocation5 + $0x5c] sm:$0xf]  ;;  %v4131_v3 = vor.u32 %v5079_v57, %v4128_v58  ;;  %v4534_v57 = vld [vmem:[#allocation8 + $0x1e0] sm:$0xf]  ;;  %v5185_v58 = vld [vmem:[#allocation8 + $0x1e4] sm:$0xf0] }
 0x129   :  { %2069 = vmatpush.bf16.msrb.mxu3 %v4195_v37  ;;  %2044 = vmatpush.bf16.msrb.mxu1 %v3651_v46  ;;  %v3328_v0 = vld [vmem:[#allocation5 + $0x78] sm:$0xf0]  ;;  %v4479_v46 = vor.u32 %v5171_v35, %v4478_v34  ;;  %v4382_v27 = vld [vmem:[#allocation8 + $0xb0] sm:$0xf] }
 0x12a   :  { %v4943_v1 = vld [vmem:[#allocation5 + $0x25c] sm:$0xf]  ;;  %v3331_v12 = vor.u32 %v4879_v63, %v3328_v0  ;;  %v4398_v63 = vld [vmem:[#allocation8 + $0xd0] sm:$0xf]  ;;  %v5151_v0 = vld [vmem:[#allocation8 + $0xd4] sm:$0xf0] }
 0x12b   :  { %2057 = vmatpush.bf16.msrb.mxu2 %v3907_v47  ;;  %v3584_v4 = vld [vmem:[#allocation5 + $0x278] sm:$0xf0]  ;;  %2032 = vmatpush.bf16.msrb.mxu0 %v3363_v59  ;;  %v4342_v47 = vld [vmem:[#allocation8 + $0x60] sm:$0xf]  ;;  %v4407_v59 = vor.u32 %v5153_v50, %v4406_v49  ;;  %v5161_v49 = vld [vmem:[#allocation8 + $0x124] sm:$0xf0] }
 0x12c   :  { %v5007_v5 = vld [vmem:[#allocation5 + $0x45c] sm:$0xf]  ;;  %v3587_v16 = vor.u32 %v4943_v1, %v3584_v4  ;;  %v4343_v55 = vor.u32 %v5137_v48, %v4342_v47  ;;  %v4462_v1 = vld [vmem:[#allocation8 + $0x150] sm:$0xf]  ;;  %v5145_v47 = vld [vmem:[#allocation8 + $0xa4] sm:$0xf0] }
 0x12d   :  { %2070 = vmatpush.bf16.msrb.mxu3 %v4163_v52  ;;  %v3840_v7 = vld [vmem:[#allocation5 + $0x478] sm:$0xf0]  ;;  %2045 = vmatpush.bf16.msrb.mxu1 %v3619_v61  ;;  %v4470_v52 = vld [vmem:[#allocation8 + $0x160] sm:$0xf]  ;;  %v4334_v61 = vld [vmem:[#allocation8 + $0x50] sm:$0xf] }
 0x12e   :  { %v5071_v10 = vld [vmem:[#allocation5 + $0x65c] sm:$0xf]  ;;  %v3843_v17 = vor.u32 %v5007_v5, %v3840_v7  ;;  %v4471_v60 = vor.u32 %v5169_v53, %v4470_v52  ;;  %v4526_v5 = vld [vmem:[#allocation8 + $0x1d0] sm:$0xf]  ;;  %v5183_v7 = vld [vmem:[#allocation8 + $0x1d4] sm:$0xf0] }
 0x12f   :  { %v4096_v11 = vld [vmem:[#allocation5 + $0x678] sm:$0xf0]  ;;  %2058 = vmatpush.bf16.msrb.mxu2 %v3875_v62  ;;  %2033 = vmatpush.bf16.msrb.mxu0 %v3331_v12  ;;  %v5135_v62 = vld [vmem:[#allocation8 + $0x54] sm:$0xf0]  ;;  %v5133_v12 = vld [vmem:[#allocation8 + $0x44] sm:$0xf0] }
 0x130   :  { %v4871_v13 = vld [vmem:[#allocation5 + $0x1c] sm:$0xf]  ;;  %v4099_v22 = vor.u32 %v5071_v10, %v4096_v11  ;;  %v4335_v4 = vor.u32 %v5135_v62, %v4334_v61  ;;  %v4399_v10 = vor.u32 %v5151_v0, %v4398_v63  ;;  %v4463_v11 = vor.u32 %v5167_v2, %v4462_v1  ;;  %v4438_v48 = vld [vmem:[#allocation8 + $0x120] sm:$0xf]  ;;  %v4302_v61 = vld [vmem:[#allocation8 + $0x10] sm:$0xf] }
 0x131   :  { %v3296_v14 = vld [vmem:[#allocation5 + $0x38] sm:$0xf0]  ;;  %2071 = vmatpush.bf16.msrb.mxu3 %v4131_v3  ;;  %2046 = vmatpush.bf16.msrb.mxu1 %v3587_v16  ;;  %v4535_v3 = vor.u32 %v5185_v58, %v4534_v57  ;;  %v5165_v16 = vld [vmem:[#allocation8 + $0x144] sm:$0xf0]  ;;  %v5127_v62 = vld [vmem:[#allocation8 + $0x14] sm:$0xf0] }
 0x132   :  { %v4935_v18 = vld [vmem:[#allocation5 + $0x21c] sm:$0xf]  ;;  %v3299_v32 = vor.u32 %v4871_v13, %v3296_v14  ;;  %v5149_v13 = vld [vmem:[#allocation8 + $0xc4] sm:$0xf0]  ;;  %v4454_v14 = vld [vmem:[#allocation8 + $0x140] sm:$0xf] }
 0x133   :  { %v3552_v19 = vld [vmem:[#allocation5 + $0x238] sm:$0xf0]  ;;  %2059 = vmatpush.bf16.msrb.mxu2 %v3843_v17  ;;  %v4527_v17 = vor.u32 %v5183_v7, %v4526_v5  ;;  %v1828_v21 = vpop.f32.mrf.mxu0  ;;  %v5177_v57 = vld [vmem:[#allocation8 + $0x1a4] sm:$0xf0]  ;;  %v4366_v63 = vld [vmem:[#allocation8 + $0x90] sm:$0xf]  ;;  %v4303_v7 = vor.u32 %v5127_v62, %v4302_v61 }
 0x134   :  { %v4999_v20 = vld [vmem:[#allocation5 + $0x41c] sm:$0xf]  ;;  %v3555_v37 = vor.u32 %v4935_v18, %v3552_v19  ;;  %2034 = vmatpush.bf16.msrb.mxu0 %v3299_v32  ;;  %v4518_v19 = vld [vmem:[#allocation8 + $0x1c0] sm:$0xf]  ;;  %v5163_v32 = vld [vmem:[#allocation8 + $0x134] sm:$0xf0] }
 0x135   :  { %v3808_v23 = vld [vmem:[#allocation5 + $0x438] sm:$0xf0]  ;;  %2072 = vmatpush.bf16.msrb.mxu3 %v4099_v22  ;;  %v1841_v28 = vpop.f32.mrf.mxu1  ;;  %v5143_v1 = vld [vmem:[#allocation8 + $0x94] sm:$0xf0]  ;;  %v4430_v2 = vld [vmem:[#allocation8 + $0x110] sm:$0xf] }
 0x136   :  { %v5063_v24 = vld [vmem:[#allocation5 + $0x61c] sm:$0xf]  ;;  %v3811_v39 = vor.u32 %v4999_v20, %v3808_v23  ;;  %2047 = vmatpush.bf16.msrb.mxu1 %v3555_v37  ;;  %v5181_v20 = vld [vmem:[#allocation8 + $0x1c4] sm:$0xf0]  ;;  %v4455_v23 = vor.u32 %v5165_v16, %v4454_v14  ;;  %v4510_v37 = vld [vmem:[#allocation8 + $0x1b0] sm:$0xf] }
 0x137   :  { %v4064_v26 = vld [vmem:[#allocation5 + $0x638] sm:$0xf0]  ;;  %2035 = vmatmul.bf16.vlgmr.msrb.gmra.mxu0 %v5507_v9  ;;  %v4326_v9 = vld [vmem:[#allocation8 + $0x40] sm:$0xf]  ;;  %v4519_v34 = vor.u32 %v5181_v20, %v4518_v19  ;;  %v5141_v16 = vld [vmem:[#allocation8 + $0x84] sm:$0xf0] }
 0x138   :  { %v4067_v40 = vor.u32 %v5063_v24, %v4064_v26  ;;  %2060 = vmatpush.bf16.msrb.mxu2 %v3811_v39  ;;  %2869 = vmatpush.bf16.msra.mxu0 %v4351_v41  ;;  %v4327_v18 = vor.u32 %v5133_v12, %v4326_v9  ;;  %v4318_v24 = vld [vmem:[#allocation8 + $0x30] sm:$0xf]  ;;  %v5131_v26 = vld [vmem:[#allocation8 + $0x34] sm:$0xf0]  ;;  %v4447_v41 = vor.u32 %v5163_v32, %v4446_v31  ;;  %v4294_v9 = vld [vmem:[#allocation8] sm:$0xf] }
 0x139   :  { %2048 = vmatmul.bf16.vlgmr.msrb.gmra.mxu1 %v5514_v25  ;;  %v4390_v25 = vld [vmem:[#allocation8 + $0xc0] sm:$0xf]  ;;  %v4319_v35 = vor.u32 %v5131_v26, %v4318_v24  ;;  %v5179_v39 = vld [vmem:[#allocation8 + $0x1b4] sm:$0xf0]  ;;  %v4367_v12 = vor.u32 %v5143_v1, %v4366_v63 }
 0x13a   :  { %2073 = vmatpush.bf16.msrb.mxu3 %v4067_v40  ;;  %2882 = vmatpush.bf16.msra.mxu1 %v4415_v45  ;;  %v4391_v22 = vor.u32 %v5149_v13, %v4390_v25  ;;  %v4383_v40 = vor.u32 %v5147_v29, %v4382_v27  ;;  %v4374_v45 = vld [vmem:[#allocation8 + $0xa0] sm:$0xf]  ;;  %v4511_v53 = vor.u32 %v5179_v39, %v4510_v37  ;;  %v5125_v13 = vld [vmem:[#allocation8 + $0x4] sm:$0xf0]  ;;  %v4734_v27 = vld [vmem:[#allocation8 + $0x370] sm:$0xf] }
 0x13b   :  { %2061 = vmatmul.bf16.vlgmr.msrb.gmra.mxu2 %v5505_v8  ;;  %v369_v8 = vperm.slane %v5533_v42, 2  ;;  %v1830_v58 = vpop.f32.mrf.mxu0  ;;  %v4358_v14 = vld [vmem:[#allocation8 + $0x80] sm:$0xf]  ;;  %v4295_v26 = vor.u32 %v5125_v13, %v4294_v9  ;;  %v2079_v29 = vmax.f32 %v5536_v38, 0.0  ;;  %v5201_v39 = vld [vmem:[#allocation8 + $0x264] sm:$0xf0] }
 0x13c   :  { %2895 = vmatpush.bf16.msra.mxu2 %v4479_v46  ;;  %2870 = vmatpush.bf16.msra.mxu0 %v4343_v55  ;;  %v4502_v55 = vld [vmem:[#allocation8 + $0x1a0] sm:$0xf]  ;;  %v4359_v31 = vor.u32 %v5141_v16, %v4358_v14  ;;  %v4574_v9 = vld [vmem:[#allocation8 + $0x230] sm:$0xf]  ;;  %v5211_v14 = vld [vmem:[#allocation8 + $0x2b4] sm:$0xf0] }
 0x13d   :  { %2074 = vmatmul.bf16.vlgmr.msrb.gmra.mxu3 %v5509_v15  ;;  %v370_v15 = vperm.slane %v5533_v42, 3  ;;  %v1777_v42 = vadd.f32 %v5549_v30, %v369_v8  ;;  %v1854_v46 = vpop.f32.mrf.mxu2  ;;  %v1843_v0 = vpop.f32.mrf.mxu1  ;;  %v4503_v5 = vor.u32 %v5177_v57, %v4502_v55  ;;  %v4598_v37 = vld [vmem:[#allocation8 + $0x260] sm:$0xf]  ;;  %v4654_v55 = vld [vmem:[#allocation8 + $0x2d0] sm:$0xf] }
 0x13e   :  { %2908 = vmatpush.bf16.msra.mxu3 %v4543_v54  ;;  %2883 = vmatpush.bf16.msra.mxu1 %v4407_v59  ;;  %v4311_v54 = vor.u32 %v5129_v44, %v4310_v43  ;;  %v4375_v59 = vor.u32 %v5145_v47, %v4374_v45  ;;  %v4662_v43 = vld [vmem:[#allocation8 + $0x2e0] sm:$0xf]  ;;  %v5217_v44 = vld [vmem:[#allocation8 + $0x2e4] sm:$0xf0]  ;;  %v5215_v57 = vld [vmem:[#allocation8 + $0x2d4] sm:$0xf0] }
 0x13f   :  { %v1829_v33 = vadd.f32 %v1828_v21, %v370_v15  ;;  %v1867_v50 = vpop.f32.mrf.mxu3  ;;  %v1790_v30 = vadd.f32 %v5551_v36, %v1777_v42  ;;  %v4422_v15 = vld [vmem:[#allocation8 + $0x100] sm:$0xf]  ;;  %v5203_v21 = vld [vmem:[#allocation8 + $0x274] sm:$0xf0]  ;;  %v5233_v47 = vld [vmem:[#allocation8 + $0x364] sm:$0xf0]  ;;  %v4655_v62 = vor.u32 %v5215_v57, %v4654_v55 }
 0x140   :  { %2896 = vmatpush.bf16.msra.mxu2 %v4471_v60  ;;  %2871 = vmatpush.bf16.msra.mxu0 %v4335_v4  ;;  %v4439_v60 = vor.u32 %v5161_v49, %v4438_v48  ;;  %v4486_v42 = vld [vmem:[#allocation8 + $0x180] sm:$0xf]  ;;  %v5569_v48 = vpack.c.bf16 %v2079_v29, %v2079_v29  ;;  %v5197_v0 = vld [vmem:[#allocation8 + $0x244] sm:$0xf0]  ;;  %v4638_v13 = vld [vmem:[#allocation8 + $0x2b0] sm:$0xf] }
 0x141   :  { %v1842_v52 = vadd.f32 %v1841_v28, %v1829_v33  ;;  %v1803_v36 = vadd.f32 %v5553_v51, %v1790_v30  ;;  %v5235_v28 = vld [vmem:[#allocation8 + $0x374] sm:$0xf0]  ;;  %v5173_v33 = vld [vmem:[#allocation8 + $0x184] sm:$0xf0]  ;;  %v4590_v30 = vld [vmem:[#allocation8 + $0x250] sm:$0xf] }
 0x142   :  { %2909 = vmatpush.bf16.msra.mxu3 %v4535_v3  ;;  %2884 = vmatpush.bf16.msra.mxu1 %v4399_v10  ;;  %v5159_v3 = vld [vmem:[#allocation8 + $0x114] sm:$0xf0]  ;;  %v4494_v10 = vld [vmem:[#allocation8 + $0x190] sm:$0xf]  ;;  %v4735_v45 = vor.u32 %v5235_v28, %v4734_v27  ;;  %v4487_v38 = vor.u32 %v5173_v33, %v4486_v42  ;;  %v4582_v63 = vld [vmem:[#allocation8 + $0x240] sm:$0xf] }
 0x143   :  { %v1855_v4 = vadd.f32 %v1854_v46, %v1842_v52  ;;  %v4431_v25 = vor.u32 %v5159_v3, %v4430_v2  ;;  %v1816_v19 = vadd.f32 %v5555_v56, %v1803_v36  ;;  %v2080_v56 = vmax.f32 %v5543_v6, 0.0  ;;  %v4726_v46 = vld [vmem:[#allocation8 + $0x360] sm:$0xf]  ;;  %v5213_v2 = vld [vmem:[#allocation8 + $0x2c4] sm:$0xf0]  ;;  %v5581_v3 = vld [vmem:[#allocation7] sm:$0xff] }
 0x144   :  { %2897 = vmatpush.bf16.msra.mxu2 %v4463_v11  ;;  %2872 = vmatpush.bf16.msra.mxu0 %v4327_v18  ;;  %v5175_v11 = vld [vmem:[#allocation8 + $0x194] sm:$0xf0]  ;;  %v4606_v18 = vld [vmem:[#allocation8 + $0x270] sm:$0xf]  ;;  %v4599_v6 = vor.u32 %v5201_v39, %v4598_v37  ;;  %v4727_v58 = vor.u32 %v5233_v47, %v4726_v46  ;;  %v4646_v1 = vld [vmem:[#allocation8 + $0x2c0] sm:$0xf] }
 0x145   :  { %v1856_v8 = vpop.f32.mrf.mxu2  ;;  %v1868_v20 = vadd.f32 %v1867_v50, %v1855_v4  ;;  %v4495_v24 = vor.u32 %v5175_v11, %v4494_v10  ;;  %v5571_v49 = vpack.c.bf16 %v2080_v56, %v2080_v56  ;;  %v4663_v50 = vor.u32 %v5217_v44, %v4662_v43  ;;  %v4694_v29 = vld [vmem:[#allocation8 + $0x320] sm:$0xf]  ;;  %v4558_v56 = vld [vmem:[#allocation8 + $0x210] sm:$0xf]  ;;  %v5207_v39 = vld [vmem:[#allocation8 + $0x294] sm:$0xf0] }
 0x146   :  { %2910 = vmatpush.bf16.msra.mxu3 %v4527_v17  ;;  %2885 = vmatpush.bf16.msra.mxu1 %v4391_v22  ;;  %v5157_v17 = vld [vmem:[#allocation8 + $0x104] sm:$0xf0]  ;;  %v4670_v22 = vld [vmem:[#allocation8 + $0x2f0] sm:$0xf]  ;;  %v371_v36 = vperm.slane %v5581_v3, 4  ;;  %v4583_v10 = vor.u32 %v5197_v0, %v4582_v63  ;;  %v4647_v11 = vor.u32 %v5213_v2, %v4646_v1 }
 0x147   :  { %v1869_v51 = vpop.f32.mrf.mxu3  ;;  %v4423_v32 = vor.u32 %v5157_v17, %v4422_v15  ;;  %v4702_v17 = vld [vmem:[#allocation8 + $0x330] sm:$0xf]  ;;  %v5223_v44 = vld [vmem:[#allocation8 + $0x314] sm:$0xf0]  ;;  %v4352_v55 = vld [vmem:[#allocation8 + $0x78] sm:$0xf0] }
 0x148   :  { %2898 = vmatpush.bf16.msra.mxu2 %v4455_v23  ;;  %2873 = vmatpush.bf16.msra.mxu0 %v4319_v35  ;;  %v5219_v23 = vld [vmem:[#allocation8 + $0x2f4] sm:$0xf0]  ;;  %v4622_v37 = vld [vmem:[#allocation8 + $0x290] sm:$0xf]  ;;  %v4678_v1 = vld [vmem:[#allocation8 + $0x300] sm:$0xf] }
 0x149   :  { %v4671_v35 = vor.u32 %v5219_v23, %v4670_v22  ;;  %v5193_v22 = vld [vmem:[#allocation8 + $0x224] sm:$0xf0]  ;;  %v4630_v23 = vld [vmem:[#allocation8 + $0x2a0] sm:$0xf]  ;;  %v4686_v43 = vld [vmem:[#allocation8 + $0x310] sm:$0xf]  ;;  %v4623_v47 = vor.u32 %v5207_v39, %v4622_v37 }
 0x14a   :  { %2911 = vmatpush.bf16.msra.mxu3 %v4519_v34  ;;  %2886 = vmatpush.bf16.msra.mxu1 %v4383_v40  ;;  %v4607_v34 = vor.u32 %v5203_v21, %v4606_v18  ;;  %v2081_v40 = vmax.f32 %v1816_v19, 0.0  ;;  %v5227_v18 = vld [vmem:[#allocation8 + $0x334] sm:$0xf0]  ;;  %v4566_v21 = vld [vmem:[#allocation8 + $0x220] sm:$0xf] }
 0x14b   :  { %v4703_v27 = vor.u32 %v5227_v18, %v4702_v17  ;;  %v4567_v42 = vor.u32 %v5193_v22, %v4566_v21  ;;  %v5251_v63 = vld [vmem:[#allocation8 + $0x3f4] sm:$0xf0]  ;;  %v5221_v2 = vld [vmem:[#allocation8 + $0x304] sm:$0xf0]  ;;  %v4328_v37 = vld [vmem:[#allocation8 + $0x48] sm:$0xf0] }
 0x14c   :  { %2899 = vmatpush.bf16.msra.mxu2 %v4447_v41  ;;  %2874 = vmatpush.bf16.msra.mxu0 %v4311_v54  ;;  %v2082_v41 = vmax.f32 %v1868_v20, 0.0  ;;  %v5573_v52 = vpack.c.bf16 %v2081_v40, %v2081_v40  ;;  %v5199_v54 = vld [vmem:[#allocation8 + $0x254] sm:$0xf0]  ;;  %v4639_v20 = vor.u32 %v5211_v14, %v4638_v13  ;;  %v5152_v13 = vld [vmem:[#allocation8 + $0xe4] sm:$0xf] }
 0x14d   :  { %v4591_v61 = vor.u32 %v5199_v54, %v4590_v30  ;;  %v5205_v30 = vld [vmem:[#allocation8 + $0x284] sm:$0xf0]  ;;  %v5138_v54 = vld [vmem:[#allocation8 + $0x74] sm:$0xf]  ;;  %v4408_v14 = vld [vmem:[#allocation8 + $0xe8] sm:$0xf0] }
 0x14e   :  { %2912 = vmatpush.bf16.msra.mxu3 %v4511_v53  ;;  %2887 = vmatpush.bf16.msra.mxu1 %v4375_v59  ;;  %v5575_v53 = vpack.c.bf16 %v2082_v41, %v2082_v41  ;;  %v4718_v59 = vld [vmem:[#allocation8 + $0x350] sm:$0xf]  ;;  %v4411_v22 = vor.u32 %v5152_v13, %v4408_v14  ;;  %v5148_v39 = vld [vmem:[#allocation8 + $0xc4] sm:$0xf] }
 0x150   :  { %2900 = vmatpush.bf16.msra.mxu2 %v4439_v60  ;;  %2875 = vmatpush.bf16.msra.mxu0 %v4303_v7  ;;  %v5231_v60 = vld [vmem:[#allocation8 + $0x354] sm:$0xf0]  ;;  %v5229_v7 = vld [vmem:[#allocation8 + $0x344] sm:$0xf0] }
 0x151   :  { %v4719_v4 = vor.u32 %v5231_v60, %v4718_v59  ;;  %v4798_v59 = vld [vmem:[#allocation8 + $0x3f0] sm:$0xf]  ;;  %v5154_v60 = vld [vmem:[#allocation8 + $0xf4] sm:$0xf] }
 0x152   :  { %2913 = vmatpush.bf16.msra.mxu3 %v4503_v5  ;;  %2888 = vmatpush.bf16.msra.mxu1 %v4367_v12  ;;  %v4710_v5 = vld [vmem:[#allocation8 + $0x340] sm:$0xf] }
 0x153   :  { %v1880_v12 = vpop.f32.mrf.mxu0  ;;  %v4711_v15 = vor.u32 %v5229_v7, %v4710_v5  ;;  %v5170_v7 = vld [vmem:[#allocation8 + $0x174] sm:$0xf] }
 0x154   :  { %2901 = vmatpush.bf16.msra.mxu2 %v4431_v25  ;;  %2876 = vmatpush.bf16.msra.mxu0 %v4295_v26  ;;  %v5195_v25 = vld [vmem:[#allocation8 + $0x234] sm:$0xf0]  ;;  %v1881_v16 = vadd.f32 %v1880_v12, %v371_v36  ;;  %v4799_v36 = vor.u32 %v5251_v63, %v4798_v59  ;;  %v5136_v12 = vld [vmem:[#allocation8 + $0x64] sm:$0xf]  ;;  %v4766_v59 = vld [vmem:[#allocation8 + $0x3b0] sm:$0xf] }
 0x155   :  { %v1893_v8 = vpop.f32.mrf.mxu1  ;;  %v4575_v19 = vor.u32 %v5195_v25, %v4574_v9  ;;  %v4344_v25 = vld [vmem:[#allocation8 + $0x68] sm:$0xf0] }
 0x156   :  { %2914 = vmatpush.bf16.msra.mxu3 %v4495_v24  ;;  %2889 = vmatpush.bf16.msra.mxu1 %v4359_v31  ;;  %v1894_v51 = vadd.f32 %v1893_v8, %v1881_v16  ;;  %v5209_v24 = vld [vmem:[#allocation8 + $0x2a4] sm:$0xf0]  ;;  %v4679_v16 = vor.u32 %v5221_v2, %v4678_v1  ;;  %v4790_v8 = vld [vmem:[#allocation8 + $0x3e0] sm:$0xf]  ;;  %v4347_v21 = vor.u32 %v5136_v12, %v4344_v25  ;;  %v5162_v1 = vld [vmem:[#allocation8 + $0x134] sm:$0xf] }
 0x157   :  { %2877 = vmatmul.bf16.vlgmr.msra.gmra.mxu0 %v5569_v48  ;;  %v5225_v31 = vld [vmem:[#allocation8 + $0x324] sm:$0xf0]  ;;  %v4631_v33 = vor.u32 %v5209_v24, %v4630_v23  ;;  %v5134_v23 = vld [vmem:[#allocation8 + $0x54] sm:$0xf]  ;;  %v4336_v24 = vld [vmem:[#allocation8 + $0x58] sm:$0xf0] }
 0x158   :  { %2902 = vmatpush.bf16.msra.mxu2 %v4423_v32  ;;  %2921 = vmatpush.bf16.msrb.mxu0 %v4607_v34  ;;  %v4695_v41 = vor.u32 %v5225_v31, %v4694_v29  ;;  %v5247_v29 = vld [vmem:[#allocation8 + $0x3d4] sm:$0xf0]  ;;  %v4448_v2 = vld [vmem:[#allocation8 + $0x138] sm:$0xf0]  ;;  %v4758_v12 = vld [vmem:[#allocation8 + $0x3a0] sm:$0xf] }
 0x159   :  { %2890 = vmatmul.bf16.vlgmr.msra.gmra.mxu1 %v5571_v49  ;;  %v5241_v25 = vld [vmem:[#allocation8 + $0x3a4] sm:$0xf0]  ;;  %v4451_v14 = vor.u32 %v5162_v1, %v4448_v2 }
 0x15a   :  { %2934 = vmatpush.bf16.msrb.mxu1 %v4671_v35  ;;  %2915 = vmatpush.bf16.msra.mxu3 %v4487_v38  ;;  %v5191_v35 = vld [vmem:[#allocation8 + $0x214] sm:$0xf0]  ;;  %v4550_v38 = vld [vmem:[#allocation8 + $0x200] sm:$0xf] }
 0x15b   :  { %2903 = vmatmul.bf16.vlgmr.msra.gmra.mxu2 %v5573_v52  ;;  %v1882_v34 = vpop.f32.mrf.mxu0  ;;  %v4559_v46 = vor.u32 %v5191_v35, %v4558_v56  ;;  %v4339_v56 = vor.u32 %v5134_v23, %v4336_v24  ;;  %v5132_v35 = vld [vmem:[#allocation8 + $0x44] sm:$0xf]  ;;  %v5142_v23 = vld [vmem:[#allocation8 + $0x94] sm:$0xf] }
 0x15c   :  { %2947 = vmatpush.bf16.msrb.mxu2 %v4735_v45  ;;  %2922 = vmatpush.bf16.msrb.mxu0 %v4599_v6  ;;  %v5189_v6 = vld [vmem:[#allocation8 + $0x204] sm:$0xf0] }
 0x15d   :  { %2916 = vmatmul.bf16.vlgmr.msra.gmra.mxu3 %v5575_v53  ;;  %v1906_v26 = vpop.f32.mrf.mxu2  ;;  %v1895_v40 = vpop.f32.mrf.mxu1 }
 0x15e   :  { %2935 = vmatpush.bf16.msrb.mxu1 %v4663_v50  ;;  %v1907_v32 = vadd.f32 %v1906_v26, %v1894_v51  ;;  %v4614_v50 = vld [vmem:[#allocation8 + $0x280] sm:$0xf]  ;;  %2960 = vmatpush.bf16.msrb.mxu3 %v4799_v36  ;;  %v5150_v26 = vld [vmem:[#allocation8 + $0xd4] sm:$0xf]  ;;  %v4392_v40 = vld [vmem:[#allocation8 + $0xc8] sm:$0xf0] }
 0x15f   :  { %v1919_v28 = vpop.f32.mrf.mxu3  ;;  %v4615_v5 = vor.u32 %v5205_v30, %v4614_v50  ;;  %v4395_v50 = vor.u32 %v5148_v39, %v4392_v40  ;;  %v5130_v30 = vld [vmem:[#allocation8 + $0x34] sm:$0xf]  ;;  %v4432_v39 = vld [vmem:[#allocation8 + $0x118] sm:$0xf0] }
 0x160   :  { %2948 = vmatpush.bf16.msrb.mxu2 %v4727_v58  ;;  %2923 = vmatpush.bf16.msrb.mxu0 %v4591_v61  ;;  %v1920_v45 = vadd.f32 %v1919_v28, %v1907_v32  ;;  %v4687_v58 = vor.u32 %v5223_v44, %v4686_v43  ;;  %v4416_v61 = vld [vmem:[#allocation8 + $0xf8] sm:$0xf0]  ;;  %v4782_v28 = vld [vmem:[#allocation8 + $0x3d0] sm:$0xf]  ;;  %v5245_v43 = vld [vmem:[#allocation8 + $0x3c4] sm:$0xf0] }
 0x161   :  { %v4419_v9 = vor.u32 %v5154_v60, %v4416_v61  ;;  %v4783_v32 = vor.u32 %v5247_v29, %v4782_v28  ;;  %v372_v44 = vperm.slane %v5581_v3, 5  ;;  %v5243_v60 = vld [vmem:[#allocation8 + $0x3b4] sm:$0xf0]  ;;  %v4750_v28 = vld [vmem:[#allocation8 + $0x390] sm:$0xf] }
 0x162   :  { %2936 = vmatpush.bf16.msrb.mxu1 %v4655_v62  ;;  %v2083_v0 = vmax.f32 %v1920_v45, 0.0  ;;  %v5239_v29 = vld [vmem:[#allocation8 + $0x394] sm:$0xf0] }
 0x164   :  { %2949 = vmatpush.bf16.msrb.mxu2 %v4719_v4  ;;  %2924 = vmatpush.bf16.msrb.mxu0 %v4583_v10  ;;  %v4551_v4 = vor.u32 %v5189_v6, %v4550_v38  ;;  %v4480_v10 = vld [vmem:[#allocation8 + $0x178] sm:$0xf0]  ;;  %v5584_v17 = vpack.c.bf16 %v2083_v0, %v2083_v0  ;;  %v4331_v6 = vor.u32 %v5132_v35, %v4328_v37  ;;  %v5140_v35 = vld [vmem:[#allocation8 + $0x84] sm:$0xf]  ;;  %v5158_v37 = vld [vmem:[#allocation8 + $0x114] sm:$0xf] }
 0x165   :  { %v1908_v57 = vpop.f32.mrf.mxu2  ;;  %v4483_v18 = vor.u32 %v5170_v7, %v4480_v10  ;;  %v4767_v0 = vor.u32 %v5243_v60, %v4766_v59  ;;  %v5128_v7 = vld [vmem:[#allocation8 + $0x24] sm:$0xf]  ;;  %v4312_v10 = vld [vmem:[#allocation8 + $0x28] sm:$0xf0] }
 0x166   :  { %2937 = vmatpush.bf16.msrb.mxu1 %v4647_v11  ;;  %v4355_v11 = vor.u32 %v5138_v54, %v4352_v55  ;;  %v4320_v54 = vld [vmem:[#allocation8 + $0x38] sm:$0xf0]  ;;  %v5146_v55 = vld [vmem:[#allocation8 + $0xb4] sm:$0xf]  ;;  %v5156_v60 = vld [vmem:[#allocation8 + $0x104] sm:$0xf] }
 0x167   :  { %v1921_v62 = vpop.f32.mrf.mxu3 }
 0x168   :  { %2950 = vmatpush.bf16.msrb.mxu2 %v4711_v15  ;;  %2925 = vmatpush.bf16.msrb.mxu0 %v4575_v19  ;;  %v5249_v15 = vld [vmem:[#allocation8 + $0x3e4] sm:$0xf0]  ;;  %v5168_v19 = vld [vmem:[#allocation8 + $0x164] sm:$0xf] }
 0x169   :  { %v4791_v51 = vor.u32 %v5249_v15, %v4790_v8 }
 0x16a   :  { %2938 = vmatpush.bf16.msrb.mxu1 %v4639_v20  ;;  %v4472_v20 = vld [vmem:[#allocation8 + $0x168] sm:$0xf0] }
 0x16b   :  { %2961 = vmatpush.bf16.msrb.mxu3 %v4791_v51  ;;  %v4475_v31 = vor.u32 %v5168_v19, %v4472_v20  ;;  %v4440_v51 = vld [vmem:[#allocation8 + $0x128] sm:$0xf0]  ;;  %v4315_v19 = vor.u32 %v5128_v7, %v4312_v10  ;;  %v5216_v10 = vld [vmem:[#allocation8 + $0x2e4] sm:$0xf] }
 0x16c   :  { %2951 = vmatpush.bf16.msrb.mxu2 %v4703_v27  ;;  %2926 = vmatpush.bf16.msrb.mxu0 %v4567_v42  ;;  %v4400_v27 = vld [vmem:[#allocation8 + $0xd8] sm:$0xf0]  ;;  %v5166_v42 = vld [vmem:[#allocation8 + $0x154] sm:$0xf]  ;;  %v4600_v7 = vld [vmem:[#allocation8 + $0x268] sm:$0xf0] }
 0x16d   :  { %v4403_v34 = vor.u32 %v5150_v26, %v4400_v27  ;;  %v4368_v26 = vld [vmem:[#allocation8 + $0x98] sm:$0xf0] }
 0x16e   :  { %2939 = vmatpush.bf16.msrb.mxu1 %v4631_v33  ;;  %v4464_v33 = vld [vmem:[#allocation8 + $0x158] sm:$0xf0] }
 0x16f   :  { %2962 = vmatpush.bf16.msrb.mxu3 %v4783_v32  ;;  %v4467_v45 = vor.u32 %v5166_v42, %v4464_v33  ;;  %v4751_v42 = vor.u32 %v5239_v29, %v4750_v28  ;;  %v4648_v28 = vld [vmem:[#allocation8 + $0x2c8] sm:$0xf0] }
 0x170   :  { %2952 = vmatpush.bf16.msrb.mxu2 %v4695_v41  ;;  %2927 = vmatpush.bf16.msrb.mxu0 %v4559_v46  ;;  %v4774_v41 = vld [vmem:[#allocation8 + $0x3c0] sm:$0xf]  ;;  %v5164_v46 = vld [vmem:[#allocation8 + $0x144] sm:$0xf] }
 0x171   :  { %v4775_v38 = vor.u32 %v5245_v43, %v4774_v41  ;;  %v4371_v41 = vor.u32 %v5142_v23, %v4368_v26  ;;  %v4360_v43 = vld [vmem:[#allocation8 + $0x88] sm:$0xf0] }
 0x172   :  { %2940 = vmatpush.bf16.msrb.mxu1 %v4623_v47  ;;  %v4456_v47 = vld [vmem:[#allocation8 + $0x148] sm:$0xf0] }
 0x173   :  { %v1932_v57 = vpop.f32.mrf.mxu0  ;;  %2963 = vmatpush.bf16.msrb.mxu3 %v4775_v38  ;;  %v4459_v63 = vor.u32 %v5164_v46, %v4456_v47  ;;  %v5218_v46 = vld [vmem:[#allocation8 + $0x2f4] sm:$0xf]  ;;  %v4742_v47 = vld [vmem:[#allocation8 + $0x380] sm:$0xf]  ;;  %v4584_v26 = vld [vmem:[#allocation8 + $0x248] sm:$0xf0] }
 0x174   :  { %2953 = vmatpush.bf16.msrb.mxu2 %v4687_v58  ;;  %2928 = vmatpush.bf16.msrb.mxu0 %v4551_v4  ;;  %v4384_v58 = vld [vmem:[#allocation8 + $0xb8] sm:$0xf0]  ;;  %v1933_v61 = vadd.f32 %v1932_v57, %v372_v44  ;;  %v4323_v4 = vor.u32 %v5130_v30, %v4320_v54  ;;  %v5202_v44 = vld [vmem:[#allocation8 + $0x274] sm:$0xf]  ;;  %v4435_v54 = vor.u32 %v5158_v37, %v4432_v39 }
 0x175   :  { %v1945_v62 = vpop.f32.mrf.mxu1  ;;  %v5186_v57 = vld [vmem:[#allocation8 + $0x1f4] sm:$0xf]  ;;  %v4512_v37 = vld [vmem:[#allocation8 + $0x1b8] sm:$0xf0] }
 0x176   :  { %2941 = vmatpush.bf16.msrb.mxu1 %v4615_v5  ;;  %v1946_v36 = vadd.f32 %v1945_v62, %v1933_v61  ;;  %v4387_v5 = vor.u32 %v5146_v55, %v4384_v58  ;;  %v4544_v58 = vld [vmem:[#allocation8 + $0x1f8] sm:$0xf0]  ;;  %v4424_v61 = vld [vmem:[#allocation8 + $0x108] sm:$0xf0] }
 0x177   :  { %2929 = vmatmul.bf16.vlgmr.msrb.gmra.mxu0 %v5584_v17  ;;  %2964 = vmatpush.bf16.msrb.mxu3 %v4767_v0  ;;  %v4547_v62 = vor.u32 %v5186_v57, %v4544_v58  ;;  %v4363_v0 = vor.u32 %v5140_v35, %v4360_v43  ;;  %v5178_v35 = vld [vmem:[#allocation8 + $0x1b4] sm:$0xf] }
 0x178   :  { %2973 = vmatpush.bf16.msra.mxu0 %v4355_v11  ;;  %2954 = vmatpush.bf16.msrb.mxu2 %v4679_v16  ;;  %v5144_v11 = vld [vmem:[#allocation8 + $0xa4] sm:$0xf]  ;;  %v4759_v16 = vor.u32 %v5241_v25, %v4758_v12  ;;  %v5182_v25 = vld [vmem:[#allocation8 + $0x1d4] sm:$0xf] }
 0x17a   :  { %2986 = vmatpush.bf16.msra.mxu1 %v4419_v9  ;;  %v4376_v9 = vld [vmem:[#allocation8 + $0xa8] sm:$0xf0] }
 0x17b   :  { %v4379_v20 = vor.u32 %v5144_v11, %v4376_v9  ;;  %v1934_v27 = vpop.f32.mrf.mxu0  ;;  %2965 = vmatpush.bf16.msrb.mxu3 %v4759_v16  ;;  %v4664_v11 = vld [vmem:[#allocation8 + $0x2e8] sm:$0xf0]  ;;  %v4427_v9 = vor.u32 %v5156_v60, %v4424_v61 }
 0x17c   :  { %2999 = vmatpush.bf16.msra.mxu2 %v4483_v18  ;;  %2974 = vmatpush.bf16.msra.mxu0 %v4347_v21  ;;  %v5160_v18 = vld [vmem:[#allocation8 + $0x124] sm:$0xf]  ;;  %v5126_v21 = vld [vmem:[#allocation8 + $0x14] sm:$0xf]  ;;  %v4667_v16 = vor.u32 %v5216_v10, %v4664_v11  ;;  %v4736_v11 = vld [vmem:[#allocation8 + $0x378] sm:$0xf0] }
 0x17d   :  { %v1958_v13 = vpop.f32.mrf.mxu2  ;;  %v4443_v32 = vor.u32 %v5160_v18, %v4440_v51  ;;  %v5214_v18 = vld [vmem:[#allocation8 + $0x2d4] sm:$0xf]  ;;  %v4656_v51 = vld [vmem:[#allocation8 + $0x2d8] sm:$0xf0]  ;;  %v5212_v27 = vld [vmem:[#allocation8 + $0x2c4] sm:$0xf] }
 0x17e   :  { %2987 = vmatpush.bf16.msra.mxu1 %v4411_v22  ;;  %v1959_v8 = vadd.f32 %v1958_v13, %v1946_v36  ;;  %v4304_v22 = vld [vmem:[#allocation8 + $0x18] sm:$0xf0]  ;;  %v5200_v36 = vld [vmem:[#allocation8 + $0x264] sm:$0xf]  ;;  %v4659_v23 = vor.u32 %v5214_v18, %v4656_v51  ;;  %v5234_v10 = vld [vmem:[#allocation8 + $0x374] sm:$0xf] }
 0x17f   :  { %v1971_v15 = vpop.f32.mrf.mxu3  ;;  %v4307_v40 = vor.u32 %v5126_v21, %v4304_v22  ;;  %2966 = vmatpush.bf16.msrb.mxu3 %v4751_v42  ;;  %v4528_v13 = vld [vmem:[#allocation8 + $0x1d8] sm:$0xf0]  ;;  %v4520_v21 = vld [vmem:[#allocation8 + $0x1c8] sm:$0xf0]  ;;  %v4651_v42 = vor.u32 %v5212_v27, %v4648_v28  ;;  %v5172_v18 = vld [vmem:[#allocation8 + $0x184] sm:$0xf] }
 0x180   :  { %3000 = vmatpush.bf16.msra.mxu2 %v4475_v31  ;;  %2975 = vmatpush.bf16.msra.mxu0 %v4339_v56  ;;  %v1972_v24 = vadd.f32 %v1971_v15, %v1959_v8  ;;  %v1947_v31 = vpop.f32.mrf.mxu1  ;;  %v5124_v56 = vld [vmem:[#allocation8 + $0x4] sm:$0xf]  ;;  %v5198_v8 = vld [vmem:[#allocation8 + $0x254] sm:$0xf]  ;;  %v4592_v15 = vld [vmem:[#allocation8 + $0x258] sm:$0xf0] }
 0x181   :  { %v4595_v22 = vor.u32 %v5198_v8, %v4592_v15  ;;  %v373_v31 = vperm.slane %v5581_v3, 6  ;;  %v5204_v8 = vld [vmem:[#allocation8 + $0x284] sm:$0xf]  ;;  %v4616_v15 = vld [vmem:[#allocation8 + $0x288] sm:$0xf0] }
 0x182   :  { %2988 = vmatpush.bf16.msra.mxu1 %v4403_v34  ;;  %v2084_v33 = vmax.f32 %v1972_v24, 0.0  ;;  %v4296_v34 = vld [vmem:[#allocation8 + $0x8] sm:$0xf0]  ;;  %v5196_v24 = vld [vmem:[#allocation8 + $0x244] sm:$0xf]  ;;  %v4619_v27 = vor.u32 %v5204_v8, %v4616_v15 }
 0x183   :  { %v4488_v51 = vld [vmem:[#allocation8 + $0x188] sm:$0xf0] }
 0x184   :  { %3001 = vmatpush.bf16.msra.mxu2 %v4467_v45  ;;  %2976 = vmatpush.bf16.msra.mxu0 %v4331_v6  ;;  %v4608_v45 = vld [vmem:[#allocation8 + $0x278] sm:$0xf0]  ;;  %v5588_v38 = vpack.c.bf16 %v2084_v33, %v2084_v33  ;;  %v5237_v6 = vld [vmem:[#allocation8 + $0x384] sm:$0xf0]  ;;  %v5194_v33 = vld [vmem:[#allocation8 + $0x234] sm:$0xf] }
 0x185   :  { %v1960_v30 = vpop.f32.mrf.mxu2  ;;  %v4743_v55 = vor.u32 %v5237_v6, %v4742_v47  ;;  %v4611_v1 = vor.u32 %v5202_v44, %v4608_v45  ;;  %v4568_v47 = vld [vmem:[#allocation8 + $0x228] sm:$0xf0]  ;;  %v5208_v6 = vld [vmem:[#allocation8 + $0x2a4] sm:$0xf] }
 0x186   :  { %2989 = vmatpush.bf16.msra.mxu1 %v4395_v50  ;;  %v4672_v50 = vld [vmem:[#allocation8 + $0x2f8] sm:$0xf0]  ;;  %v4632_v30 = vld [vmem:[#allocation8 + $0x2a8] sm:$0xf0] }
 0x187   :  { %2942 = vmatmul.bf16.vlgmr.msrb.gmra.mxu1 %v5588_v38  ;;  %v1973_v59 = vpop.f32.mrf.mxu3  ;;  %v4675_v2 = vor.u32 %v5218_v46, %v4672_v50  ;;  %2967 = vmatpush.bf16.msrb.mxu3 %v4743_v55  ;;  %v5192_v46 = vld [vmem:[#allocation8 + $0x224] sm:$0xf]  ;;  %v4504_v55 = vld [vmem:[#allocation8 + $0x1a8] sm:$0xf0]  ;;  %v4635_v61 = vor.u32 %v5208_v6, %v4632_v30 }
 0x188   :  { %3002 = vmatpush.bf16.msra.mxu2 %v4459_v63  ;;  %2977 = vmatpush.bf16.msra.mxu0 %v4323_v4  ;;  %v4299_v63 = vor.u32 %v5124_v56, %v4296_v34  ;;  %v5184_v4 = vld [vmem:[#allocation8 + $0x1e4] sm:$0xf]  ;;  %v5210_v56 = vld [vmem:[#allocation8 + $0x2b4] sm:$0xf]  ;;  %v4640_v34 = vld [vmem:[#allocation8 + $0x2b8] sm:$0xf0]  ;;  %v4571_v60 = vor.u32 %v5192_v46, %v4568_v47 }
 0x189   :  { %v4643_v45 = vor.u32 %v5210_v56, %v4640_v34  ;;  %v5226_v34 = vld [vmem:[#allocation8 + $0x334] sm:$0xf]  ;;  %v4688_v47 = vld [vmem:[#allocation8 + $0x318] sm:$0xf0] }
 0x18a   :  { %2990 = vmatpush.bf16.msra.mxu1 %v4387_v5  ;;  %v4536_v5 = vld [vmem:[#allocation8 + $0x1e8] sm:$0xf0]  ;;  %v5222_v46 = vld [vmem:[#allocation8 + $0x314] sm:$0xf] }
 0x18b   :  { %3012 = vmatpush.bf16.msra.mxu3 %v4547_v62  ;;  %v4539_v12 = vor.u32 %v5184_v4, %v4536_v5  ;;  %v5190_v62 = vld [vmem:[#allocation8 + $0x214] sm:$0xf]  ;;  %v4691_v30 = vor.u32 %v5222_v46, %v4688_v47 }
 0x18c   :  { %3003 = vmatpush.bf16.msra.mxu2 %v4451_v14  ;;  %2978 = vmatpush.bf16.msra.mxu0 %v4315_v19  ;;  %v4603_v14 = vor.u32 %v5200_v36, %v4600_v7  ;;  %v4531_v19 = vor.u32 %v5182_v25, %v4528_v13  ;;  %v4496_v36 = vld [vmem:[#allocation8 + $0x198] sm:$0xf0] }
 0x18e   :  { %2991 = vmatpush.bf16.msra.mxu1 %v4379_v20  ;;  %v5180_v20 = vld [vmem:[#allocation8 + $0x1c4] sm:$0xf] }
 0x18f   :  { %3013 = vmatpush.bf16.msra.mxu3 %v4539_v12  ;;  %v4523_v29 = vor.u32 %v5180_v20, %v4520_v21  ;;  %v5188_v12 = vld [vmem:[#allocation8 + $0x204] sm:$0xf]  ;;  %v4739_v20 = vor.u32 %v5234_v10, %v4736_v11  ;;  %v4491_v21 = vor.u32 %v5172_v18, %v4488_v51 }
 0x190   :  { %3004 = vmatpush.bf16.msra.mxu2 %v4443_v32  ;;  %2979 = vmatpush.bf16.msra.mxu0 %v4307_v40  ;;  %v4587_v32 = vor.u32 %v5196_v24, %v4584_v26  ;;  %v4515_v40 = vor.u32 %v5178_v35, %v4512_v37  ;;  %v4728_v24 = vld [vmem:[#allocation8 + $0x368] sm:$0xf0]  ;;  %v4704_v35 = vld [vmem:[#allocation8 + $0x338] sm:$0xf0]  ;;  %v374_v37 = vperm.slane %v5581_v3, 7 }
 0x191   :  { %v5244_v11 = vld [vmem:[#allocation8 + $0x3c4] sm:$0xf] }
 0x192   :  { %2992 = vmatpush.bf16.msra.mxu1 %v4371_v41 }
 0x193   :  { %3014 = vmatpush.bf16.msra.mxu3 %v4531_v19  ;;  %v1984_v39 = vpop.f32.mrf.mxu0 }
 0x194   :  { %3005 = vmatpush.bf16.msra.mxu2 %v4435_v54  ;;  %2980 = vmatpush.bf16.msra.mxu0 %v4299_v63  ;;  %v1985_v41 = vadd.f32 %v1984_v39, %v373_v31  ;;  %v5176_v54 = vld [vmem:[#allocation8 + $0x1a4] sm:$0xf]  ;;  %v4560_v63 = vld [vmem:[#allocation8 + $0x218] sm:$0xf0]  ;;  %v5230_v31 = vld [vmem:[#allocation8 + $0x354] sm:$0xf]  ;;  %v4707_v39 = vor.u32 %v5226_v34, %v4704_v35 }
 0x195   :  { %v1997_v43 = vpop.f32.mrf.mxu1  ;;  %v4507_v57 = vor.u32 %v5176_v54, %v4504_v55  ;;  %v4563_v13 = vor.u32 %v5190_v62, %v4560_v63 }
 0x196   :  { %2993 = vmatpush.bf16.msra.mxu1 %v4363_v0  ;;  %v1998_v50 = vadd.f32 %v1997_v43, %v1985_v41  ;;  %v5206_v0 = vld [vmem:[#allocation8 + $0x294] sm:$0xf]  ;;  %v5224_v43 = vld [vmem:[#allocation8 + $0x324] sm:$0xf] }
 0x197   :  { %2981 = vmatmul.bf16.vlgmr.msra.gmra.mxu0 %v5569_v48  ;;  %v4576_v48 = vld [vmem:[#allocation8 + $0x238] sm:$0xf0]  ;;  %3015 = vmatpush.bf16.msra.mxu3 %v4523_v29 }
 0x198   :  { %3025 = vmatpush.bf16.msrb.mxu0 %v4611_v1  ;;  %3006 = vmatpush.bf16.msra.mxu2 %v4427_v9  ;;  %v4579_v44 = vor.u32 %v5194_v33, %v4576_v48  ;;  %v4624_v1 = vld [vmem:[#allocation8 + $0x298] sm:$0xf0]  ;;  %v5228_v33 = vld [vmem:[#allocation8 + $0x344] sm:$0xf]  ;;  %v4712_v48 = vld [vmem:[#allocation8 + $0x348] sm:$0xf0] }
 0x199   :  { %2994 = vmatmul.bf16.vlgmr.msra.gmra.mxu1 %v5571_v49  ;;  %v4715_v56 = vor.u32 %v5228_v33, %v4712_v48 }
 0x19a   :  { %3038 = vmatpush.bf16.msrb.mxu1 %v4675_v2  ;;  %v5174_v2 = vld [vmem:[#allocation8 + $0x194] sm:$0xf] }
 0x19b   :  { %3016 = vmatpush.bf16.msra.mxu3 %v4515_v40  ;;  %v1986_v5 = vpop.f32.mrf.mxu0  ;;  %v4499_v7 = vor.u32 %v5174_v2, %v4496_v36 }
 0x19c   :  { %3026 = vmatpush.bf16.msrb.mxu0 %v4603_v14  ;;  %v4627_v14 = vor.u32 %v5206_v0, %v4624_v1  ;;  %v5248_v0 = vld [vmem:[#allocation8 + $0x3e4] sm:$0xf]  ;;  %v4792_v1 = vld [vmem:[#allocation8 + $0x3e8] sm:$0xf0]  ;;  %v5246_v5 = vld [vmem:[#allocation8 + $0x3d4] sm:$0xf] }
 0x19d   :  { %v2010_v58 = vpop.f32.mrf.mxu2  ;;  %v1999_v9 = vpop.f32.mrf.mxu1 }
 0x19e   :  { %3039 = vmatpush.bf16.msrb.mxu1 %v4667_v16  ;;  %v2011_v49 = vadd.f32 %v2010_v58, %v1998_v50  ;;  %v4552_v16 = vld [vmem:[#allocation8 + $0x208] sm:$0xf0] }
 0x19f   :  { %v2023_v59 = vpop.f32.mrf.mxu3  ;;  %3017 = vmatpush.bf16.msra.mxu3 %v4507_v57  ;;  %v4555_v26 = vor.u32 %v5188_v12, %v4552_v16  ;;  %v5220_v57 = vld [vmem:[#allocation8 + $0x304] sm:$0xf]  ;;  %v4680_v58 = vld [vmem:[#allocation8 + $0x308] sm:$0xf0]  ;;  %v2223_v12 = vld [vmem:[%s5616_s4] sm:$0x3] }
 0x1a0   :  { %3027 = vmatpush.bf16.msrb.mxu0 %v4595_v22  ;;  %v2024_v4 = vadd.f32 %v2023_v59, %v2011_v49  ;;  %v5250_v59 = vld [vmem:[#allocation8 + $0x3f4] sm:$0xf]  ;;  %v4776_v9 = vld [vmem:[#allocation8 + $0x3c8] sm:$0xf0]  ;;  %v4768_v16 = vld [vmem:[#allocation8 + $0x3b8] sm:$0xf0] }
 0x1a2   :  { %3040 = vmatpush.bf16.msrb.mxu1 %v4659_v23  ;;  %v2085_v25 = vmax.f32 %v2024_v4, 0.0  ;;  %v5232_v23 = vld [vmem:[#allocation8 + $0x364] sm:$0xf]  ;;  %v4795_v4 = vor.u32 %v5248_v0, %v4792_v1  ;;  %v5266_v0 = vld [vmem:[#allocation10 + $0x70] sm:$0xff]  ;;  %v5265_v1 = vld [vmem:[#allocation10 + $0x68] sm:$0xff] }
 0x1a3   :  { %3018 = vmatpush.bf16.msra.mxu3 %v4499_v7  ;;  %v4731_v29 = vor.u32 %v5232_v23, %v4728_v24  ;;  %v4784_v7 = vld [vmem:[#allocation8 + $0x3d8] sm:$0xf0]  ;;  %v5238_v23 = vld [vmem:[#allocation8 + $0x394] sm:$0xf] }
 0x1a4   :  { %3028 = vmatpush.bf16.msrb.mxu0 %v4587_v32  ;;  %v5594_v19 = vpack.c.bf16 %v2085_v25, %v2085_v25  ;;  %v4720_v32 = vld [vmem:[#allocation8 + $0x358] sm:$0xf0]  ;;  %v4787_v10 = vor.u32 %v5246_v5, %v4784_v7  ;;  %v4779_v25 = vor.u32 %v5244_v11, %v4776_v9  ;;  %v5262_v5 = vld [vmem:[#allocation10 + $0x50] sm:$0xff]  ;;  %v5261_v9 = vld [vmem:[#allocation10 + $0x48] sm:$0xff] }
 0x1a5   :  { %v2012_v22 = vpop.f32.mrf.mxu2  ;;  %v4752_v24 = vld [vmem:[#allocation8 + $0x398] sm:$0xf0] }
 0x1a6   :  { %3041 = vmatpush.bf16.msrb.mxu1 %v4651_v42  ;;  %2955 = vmatmul.bf16.vlgmr.msrb.gmra.mxu2 %v5594_v19  ;;  %v4723_v42 = vor.u32 %v5230_v31, %v4720_v32  ;;  %v5236_v32 = vld [vmem:[#allocation8 + $0x384] sm:$0xf] }
 0x1a7   :  { %v2025_v28 = vpop.f32.mrf.mxu3  ;;  %3019 = vmatpush.bf16.msra.mxu3 %v4491_v21  ;;  %3051 = vmatpush.bf16.msrb.mxu2 %v4739_v20  ;;  %v4760_v20 = vld [vmem:[#allocation8 + $0x3a8] sm:$0xf0] }
 0x1a8   :  { %3029 = vmatpush.bf16.msrb.mxu0 %v4579_v44  ;;  %v4696_v44 = vld [vmem:[#allocation8 + $0x328] sm:$0xf0]  ;;  %v4755_v28 = vor.u32 %v5238_v23, %v4752_v24 }
 0x1aa   :  { %3042 = vmatpush.bf16.msrb.mxu1 %v4643_v45 }
 0x1ab   :  { %3052 = vmatpush.bf16.msrb.mxu2 %v4731_v29 }
 0x1ac   :  { %3030 = vmatpush.bf16.msrb.mxu0 %v4571_v60  ;;  %v4800_v60 = vld [vmem:[#allocation8 + $0x3f8] sm:$0xf0] }
 0x1ad   :  { %v4803_v62 = vor.u32 %v5250_v59, %v4800_v60  ;;  %v5252_v60 = vld [vmem:[#allocation10] sm:$0xff] }
 0x1ae   :  { %3043 = vmatpush.bf16.msrb.mxu1 %v4635_v61  ;;  %v4683_v61 = vor.u32 %v5220_v57, %v4680_v58  ;;  %v5253_v57 = vld [vmem:[#allocation10 + $0x8] sm:$0xff] }
 0x1af   :  { %3053 = vmatpush.bf16.msrb.mxu2 %v4723_v42  ;;  %v4744_v42 = vld [vmem:[#allocation8 + $0x388] sm:$0xf0] }
 0x1b0   :  { %3031 = vmatpush.bf16.msrb.mxu0 %v4563_v13  ;;  %v2225_v13 = vperm.slane %v2223_v12, 0 }
 0x1b2   :  { %3044 = vmatpush.bf16.msrb.mxu1 %v4627_v14  ;;  %v5242_v14 = vld [vmem:[#allocation8 + $0x3b4] sm:$0xf] }
 0x1b3   :  { %3054 = vmatpush.bf16.msrb.mxu2 %v4715_v56  ;;  %v4771_v15 = vor.u32 %v5242_v14, %v4768_v16  ;;  %v4747_v56 = vor.u32 %v5236_v32, %v4744_v42  ;;  %v5260_v16 = vld [vmem:[#allocation10 + $0x40] sm:$0xff] }
 0x1b4   :  { %3032 = vmatpush.bf16.msrb.mxu0 %v4555_v26  ;;  %v2036_v40 = vpop.f32.mrf.mxu0 }
 0x1b5   :  { %v2037_v45 = vadd.f32 %v2036_v40, %v374_v37 }
 0x1b6   :  { %3045 = vmatpush.bf16.msrb.mxu1 %v4619_v27  ;;  %v2049_v41 = vpop.f32.mrf.mxu1  ;;  %3007 = vmatmul.bf16.vlgmr.msra.gmra.mxu2 %v5573_v52 }
 0x1b7   :  { %3033 = vmatmul.bf16.vlgmr.msrb.gmra.mxu0 %v5584_v17  ;;  %3055 = vmatpush.bf16.msrb.mxu2 %v4707_v39  ;;  %v4699_v17 = vor.u32 %v5224_v43, %v4696_v44 }
 0x1b9   :  { %3046 = vmatmul.bf16.vlgmr.msrb.gmra.mxu1 %v5588_v38  ;;  %v2050_v38 = vadd.f32 %v2049_v41, %v2037_v45  ;;  %v5259_v41 = vld [vmem:[#allocation10 + $0x38] sm:$0xff]  ;;  %v2226_v45 = vperm.slane %v2223_v12, 1 }
 0x1ba   :  { %3213 = vmatpush.bf16.msra.mxu0 %v5259_v41 }
 0x1bb   :  { %3056 = vmatpush.bf16.msrb.mxu2 %v4699_v17  ;;  %v5258_v17 = vld [vmem:[#allocation10 + $0x30] sm:$0xff] }
 0x1bc   :  { %v2038_v3 = vpop.f32.mrf.mxu0 }
 0x1bd   :  { %v5255_v3 = vld [vmem:[#allocation10 + $0x18] sm:$0xff] }
 0x1be   :  { %v2062_v6 = vpop.f32.mrf.mxu2  ;;  %v2051_v55 = vpop.f32.mrf.mxu1  ;;  %3214 = vmatpush.bf16.msra.mxu0 %v5258_v17 }
 0x1bf   :  { %v2063_v54 = vadd.f32 %v2062_v6, %v2050_v38  ;;  %3057 = vmatpush.bf16.msrb.mxu2 %v4691_v30  ;;  %v5257_v6 = vld [vmem:[#allocation10 + $0x28] sm:$0xff]  ;;  %v5256_v30 = vld [vmem:[#allocation10 + $0x20] sm:$0xff]  ;;  %v5254_v55 = vld [vmem:[#allocation10 + $0x10] sm:$0xff] }
 0x1c0   :  { %v2075_v50 = vpop.f32.mrf.mxu3 }
 0x1c1   :  { %v2076_v49 = vadd.f32 %v2075_v50, %v2063_v54 }
 0x1c2   :  { %3215 = vmatpush.bf16.msra.mxu0 %v5257_v6 }
 0x1c3   :  { %v2086_v52 = vmax.f32 %v2076_v49, 0.0  ;;  %3058 = vmatpush.bf16.msrb.mxu2 %v4683_v61  ;;  %v5267_v61 = vld [vmem:[#allocation10 + $0x78] sm:$0xff] }
 0x1c4   :  { %3226 = vmatpush.bf16.msra.mxu1 %v5267_v61 }
 0x1c5   :  { %v2094_v63 = vpack.c.bf16 %v2086_v52, %v2086_v52 }
 0x1c6   :  { %v2064_v2 = vpop.f32.mrf.mxu2  ;;  %3059 = vmatmul.bf16.vlgmr.msrb.gmra.mxu2 %v5594_v19  ;;  %v5240_v19 = vld [vmem:[#allocation8 + $0x3a4] sm:$0xf]  ;;  %3216 = vmatpush.bf16.msra.mxu0 %v5256_v30 }
 0x1c7   :  { %2968 = vmatmul.bf16.vlgmr.msrb.gmra.mxu3 %v2094_v63  ;;  %v4763_v22 = vor.u32 %v5240_v19, %v4760_v20 }
 0x1c8   :  { %v2077_v36 = vpop.f32.mrf.mxu3  ;;  %3064 = vmatpush.bf16.msrb.mxu3 %v4803_v62  ;;  %3227 = vmatpush.bf16.msra.mxu1 %v5266_v0 }
 0x1c9   :  { %v5264_v36 = vld [vmem:[#allocation10 + $0x60] sm:$0xff] }
 0x1ca   :  { %3217 = vmatpush.bf16.msra.mxu0 %v5255_v3 }
 0x1cc   :  { %3065 = vmatpush.bf16.msrb.mxu3 %v4795_v4  ;;  %3228 = vmatpush.bf16.msra.mxu1 %v5265_v1  ;;  %v5263_v4 = vld [vmem:[#allocation10 + $0x58] sm:$0xff] }
 0x1ce   :  { %3218 = vmatpush.bf16.msra.mxu0 %v5254_v55 }
 0x1d0   :  { %3066 = vmatpush.bf16.msrb.mxu3 %v4787_v10  ;;  %3229 = vmatpush.bf16.msra.mxu1 %v5264_v36 }
 0x1d2   :  { %3219 = vmatpush.bf16.msra.mxu0 %v5253_v57 }
 0x1d4   :  { %3067 = vmatpush.bf16.msrb.mxu3 %v4779_v25  ;;  %v2878_v8 = vpop.f32.mrf.mxu0  ;;  %3230 = vmatpush.bf16.msra.mxu1 %v5263_v4 }
 0x1d5   :  { %v2879_v18 = vadd.f32 %v2878_v8, %v2225_v13 }
 0x1d6   :  { %v2891_v51 = vpop.f32.mrf.mxu1  ;;  %3220 = vmatpush.bf16.msra.mxu0 %v5252_v60 }
 0x1d7   :  { %v2892_v21 = vadd.f32 %v2891_v51, %v2879_v18  ;;  %3020 = vmatmul.bf16.vlgmr.msra.gmra.mxu3 %v5575_v53 }
 0x1d8   :  { %3068 = vmatpush.bf16.msrb.mxu3 %v4771_v15  ;;  %3231 = vmatpush.bf16.msra.mxu1 %v5262_v5 }
 0x1dc   :  { %3069 = vmatpush.bf16.msrb.mxu3 %v4763_v22  ;;  %v2880_v27 = vpop.f32.mrf.mxu0  ;;  %3232 = vmatpush.bf16.msra.mxu1 %v5261_v9 }
 0x1de   :  { %v2904_v26 = vpop.f32.mrf.mxu2  ;;  %v2893_v31 = vpop.f32.mrf.mxu1 }
 0x1df   :  { %v2905_v29 = vadd.f32 %v2904_v26, %v2892_v21 }
 0x1e0   :  { %v2917_v33 = vpop.f32.mrf.mxu3  ;;  %3070 = vmatpush.bf16.msrb.mxu3 %v4755_v28  ;;  %3233 = vmatpush.bf16.msra.mxu1 %v5260_v16 }
 0x1e1   :  { %v2918_v48 = vadd.f32 %v2917_v33, %v2905_v29  ;;  %v5280_v33 = vld [vmem:[%s5618_s6] ss:$0 sm:$0xff] }
 0x1e4   :  { %3071 = vmatpush.bf16.msrb.mxu3 %v4747_v56 }
 0x1e6   :  { %v2906_v34 = vpop.f32.mrf.mxu2 }
 0x1e7   :  { %3072 = vmatmul.bf16.vlgmr.msrb.gmra.mxu3 %v2094_v63 }
 0x1e8   :  { %v2919_v35 = vpop.f32.mrf.mxu3 }
 0x1f4   :  { %v2930_v53 = vpop.f32.mrf.mxu0 }
 0x1f5   :  { %v2931_v37 = vadd.f32 %v2930_v53, %v2918_v48 }
 0x1fc   :  { %v2932_v39 = vpop.f32.mrf.mxu0 }
 0x204   :  { %v2943_v40 = vpop.f32.mrf.mxu1 }
 0x205   :  { %v2944_v10 = vadd.f32 %v2943_v40, %v2931_v37 }
 0x20c   :  { %v2945_v44 = vpop.f32.mrf.mxu1 }
 0x214   :  { %v2982_v43 = vpop.f32.mrf.mxu0 }
 0x215   :  { %v2983_v38 = vadd.f32 %v2982_v43, %v2226_v45 }
 0x216   :  { %v2995_v47 = vpop.f32.mrf.mxu1 }
 0x217   :  { %v2996_v50 = vadd.f32 %v2995_v47, %v2983_v38 }
 0x21c   :  { %v2984_v46 = vpop.f32.mrf.mxu0 }
 0x21e   :  { %v2997_v54 = vpop.f32.mrf.mxu1 }
 0x229   :  { %v2956_v59 = vpop.f32.mrf.mxu2 }
 0x22a   :  { %v2957_v11 = vadd.f32 %v2956_v59, %v2944_v10 }
 0x231   :  { %v2958_v63 = vpop.f32.mrf.mxu2 }
 0x234   :  { %v3034_v58 = vpop.f32.mrf.mxu0 }
 0x236   :  { %v3047_v49 = vpop.f32.mrf.mxu1 }
 0x239   :  { %v3008_v2 = vpop.f32.mrf.mxu2 }
 0x23a   :  { %v3009_v19 = vadd.f32 %v3008_v2, %v2996_v50 }
 0x23c   :  { %v3036_v52 = vpop.f32.mrf.mxu0 }
 0x23e   :  { %v3049_v62 = vpop.f32.mrf.mxu1 }
 0x241   :  { %v3010_v7 = vpop.f32.mrf.mxu2 }
 0x249   :  { %v3060_v14 = vpop.f32.mrf.mxu2 }
 0x24a   :  { %v2969_v12 = vpop.f32.mrf.mxu3 }
 0x24b   :  { %v2970_v25 = vadd.f32 %v2969_v12, %v2957_v11 }
 0x24d   :  { %v3077_v13 = vmax.f32 %v2970_v25, 0.0 }
 0x24f   :  { %v3079_v8 = vpack.c.bf16 %v3077_v13, %v3077_v13 }
 0x251   :  { %3221 = vmatmul.bf16.vlgmr.msra.gmra.mxu0 %v3079_v8  ;;  %v3062_v18 = vpop.f32.mrf.mxu2 }
 0x252   :  { %v2971_v15 = vpop.f32.mrf.mxu3 }
 0x25a   :  { %v3021_v51 = vpop.f32.mrf.mxu3 }
 0x25b   :  { %v3022_v20 = vadd.f32 %v3021_v51, %v3009_v19 }
 0x25d   :  { %v3035_v21 = vadd.f32 %v3034_v58, %v3022_v20 }
 0x25f   :  { %v3048_v23 = vadd.f32 %v3047_v49, %v3035_v21 }
 0x261   :  { %v3061_v24 = vadd.f32 %v3060_v14, %v3048_v23 }
 0x262   :  { %v3023_v22 = vpop.f32.mrf.mxu3 }
 0x26a   :  { %v3073_v26 = vpop.f32.mrf.mxu3 }
 0x26b   :  { %v3074_v27 = vadd.f32 %v3073_v26, %v3061_v24 }
 0x26d   :  { %v3078_v28 = vmax.f32 %v3074_v27, 0.0 }
 0x26f   :  { %v3080_v29 = vpack.c.bf16 %v3078_v28, %v3078_v28 }
 0x271   :  { %3234 = vmatmul.bf16.vlgmr.msra.gmra.mxu1 %v3080_v29 }
 0x272   :  { %v3075_v31 = vpop.f32.mrf.mxu3 }
 0x2ce   :  { %v3222_v32 = vpop.f32.mrf.mxu0 }
 0x2cf   :  { %v3223_v48 = vadd.f32 %v5280_v33, %v3222_v32 }
 0x2d6   :  { %v3224_v42 = vpop.f32.mrf.mxu0 }
 0x2ee   :  { %v3235_v56 = vpop.f32.mrf.mxu1 }
 0x2ef   :  { %v3236_v34 = vadd.f32 %v3235_v56, %v3223_v48 }
 0x2f1   :  { %3239 = vmax.xlane.f32.xlu0 %v3236_v34 }
 0x2f6   :  { %v3237_v35 = vpop.f32.mrf.mxu1 }
 0x364   :  { %v3240_v53 = vpop.xlane.xlu0 %3239 }
 0x365   :  { %v3241_v37 = vsub.f32 %v3236_v34, %v3240_v53 }
 0x367   :  { %v3242_v39 = vmul.f32 1.442695, %v3241_v37 }
 0x369   :  { %5281 = vpow2.f32 %v3242_v39 }
 0x36f   :  { %v5282_v40 = vpop.eup %5281 }
 0x370   :  { %3244 = vadd.xlane.f32.xlu0 %v5282_v40 }
 0x3e3   :  { %v3245_v41 = vpop.xlane.xlu0 %3244 }
 0x3e4   :  { %5283 = vrcp.f32 %v3245_v41 }
 0x3ea   :  { %v5284_v43 = vpop.eup %5283 }
 0x3eb   :  { %v3247_v44 = vmul.f32 %v5284_v43, %v5282_v40 }
 0x3ed   :  { %3248 = vst [vmem:[#allocation11] sm:$0xff] %v3247_v44 }
 0x3ee   :  { %3259 = dma.vmem_to_hbm [thread:$0]  %s3255_s8, 128, %s3257_s11, [#allocation4]  }
 0x3ef   :  { %5436 = dma.done.wait [#allocation4], 128  }
 0x3f0   :  { %5437 = vsyncadd [#allocation4], 4294967168 }
 0x3f1   :  { %3264 = vsyncpa [#allocation3], 1 }
 0x3f2   :  { %3265 = vsyncpa [#allocation6], 1 }
 0x3f3   :  { %3266 = vsyncpa [#allocation9], 1 }
 0x3f4   :  { %3267 = vsyncpa [#allocation4], 1 }

</bundles_post_ra>
